<compile_context>
chip_gen: v5e
topology: v5e:2x2
jax: 0.10.0
libtpu: 0.0.40
codegen_flags: <defaults>
</compile_context>

<pallas_src>
import jax
import jax.numpy as jnp
from jax import lax
from jax.experimental import pallas as pl
from jax.experimental.pallas import tpu as pltpu

BN_EPS = 1e-5
VMEM_LIMIT = 32 * 1024 * 1024   # lifts v5e's 16 MiB default; fits v7x's 64 MiB
STAGE_TM = 4096                 # encoder stage lane tile (review: 2-4K)
MLP_TK = 4096                   # MLP reduction tile (review: 2-4K)


def _round_up(x, m):
    return ((x + m - 1) // m) * m


def _pick_tile(total, cap):
    """Largest multiple of 128 <= cap that divides `total` (a 128-multiple)."""
    t = max(128, (min(cap, total) // 128) * 128)
    while total % t:
        t -= 128
    return t


# --------------------------------------------------------------------------
# Encoder stage kernel: fused conv(2x2,s1,p1) + BN(eval) + ReLU + maxpool(2,2)
# --------------------------------------------------------------------------
def _stage_kernel(x_ref, wt_ref, sh_ref, o_ref):
    """x_ref : (4, K, TM) bf16 im2col (one slice per pool tap, lane-dense)
       wt_ref: (Cout, K) bf16 conv weights with BN scale folded in
       sh_ref: (Cout, 1) f32 folded bias + BN shift
       o_ref : (Cout, TM) bf16 pooled output (lane-dense)."""
    wt = wt_ref[...]
    acc = jnp.dot(wt, x_ref[0], preferred_element_type=jnp.float32)       # MXU
    for p in range(1, 4):                                                  # unrolled taps
        acc = jnp.maximum(acc,
                          jnp.dot(wt, x_ref[p],
                                  preferred_element_type=jnp.float32))    # max-pool
    o_ref[...] = jnp.maximum(acc + sh_ref[...], 0.0).astype(o_ref.dtype)  # shift, ReLU


def _stage_pallas(X, Wt, sh, tm=STAGE_TM):
    """X: (4, K, M) bf16, Wt: (Cout, K) bf16, sh: (Cout, 1) f32 -> (Cout, M) bf16."""
    P, K, M = X.shape
    Cout = Wt.shape[0]
    Mp = _round_up(M, 128)
    if Mp != M:  # lane alignment only (<=127 cols); padded cols sliced off below
        X = jnp.pad(X, ((0, 0), (0, 0), (0, Mp - M)))
    tm_eff = _pick_tile(Mp, tm)

    out = pl.pallas_call(
        _stage_kernel,
        out_shape=jax.ShapeDtypeStruct((Cout, Mp), jnp.bfloat16),
        grid=(Mp // tm_eff,),
        in_specs=[
            pl.BlockSpec((P, K, tm_eff), lambda i: (0, 0, i)),
            pl.BlockSpec((Cout, K), lambda i: (0, 0)),
            pl.BlockSpec((Cout, 1), lambda i: (0, 0)),
        ],
        out_specs=pl.BlockSpec((Cout, tm_eff), lambda i: (0, i)),
        compiler_params=pltpu.CompilerParams(
            dimension_semantics=("parallel",),
            vmem_limit_bytes=VMEM_LIMIT),
    )(X, Wt, sh)
    return out[:, :M] if Mp != M else out


def _im2col_taps_cm(x_cm):
    """Glue (pad/slice/concat): channel-major im2col grouped by pool tap.

    x_cm: (C, N, H, W)  ->  X: (4, 4*C, M) with M = N*Hq*Wq, Hq=(H+1)//2.
    K order is (kh, kw, cin), matching w.reshape(4*Cin, Cout) of HWIO weights.
    """
    C, N, H, W = x_cm.shape
    Hq, Wq = (H + 1) // 2, (W + 1) // 2
    xp = jnp.pad(x_cm, ((0, 0), (0, 0), (1, 1), (1, 1)))
    taps = []
    for di in range(2):          # pool-window row tap
        for dj in range(2):      # pool-window col tap
            feats = []
            for kh in range(2):  # conv kernel taps
                for kw in range(2):
                    s = xp[:, :,
                           di + kh: di + kh + 2 * Hq: 2,
                           dj + kw: dj + kw + 2 * Wq: 2]   # (C, N, Hq, Wq)
                    feats.append(s.reshape(C, N * Hq * Wq))
            taps.append(jnp.concatenate(feats, axis=0))     # (4C, M)
    return jnp.stack(taps, axis=0), (N, Hq, Wq)


# --------------------------------------------------------------------------
# MLP head: Flatten -> Linear(F,256)+ReLU (kernel 1, H split "parallel")
#           -> (Dropout id) -> Linear(256,2)+Sigmoid (tiny epilogue kernel)
# --------------------------------------------------------------------------
def _mlp_fc1_kernel(x_ref, w1_ref, b1_ref, h_ref, acc_ref):
    k = pl.program_id(1)

    @pl.when(k == 0)
    def _():
        acc_ref[...] = jnp.zeros_like(acc_ref)

    acc_ref[...] += jnp.dot(x_ref[...], w1_ref[...],
                            preferred_element_type=jnp.float32)

    @pl.when(k == pl.num_programs(1) - 1)
    def _():
        h_ref[...] = jnp.maximum(acc_ref[...] + b1_ref[...], 0.0)         # ReLU


def _mlp_fc2_kernel(h_ref, w2_ref, b2_ref, o_ref):
    z = jnp.dot(h_ref[...], w2_ref[...],
                preferred_element_type=jnp.float32) + b2_ref[...]
    o_ref[...] = 1.0 / (1.0 + jnp.exp(-z))                                 # Sigmoid (EUP)


def _mlp_pallas(x, w1p, b1, w2, b2):
    """x: (N, F) bf16, w1p: (Fp, H) bf16 (pre-padded), b1: (1, H) f32,
       w2: (H, O) f32, b2: (1, O) f32 -> (N, O) f32."""
    N, F = x.shape
    Fp, H = w1p.shape
    O = w2.shape[1]
    if Fp != F:  # small per-call pad of the activations only (w1 padded at prep)
        x = jnp.pad(x, ((0, 0), (0, Fp - F)))

    n_split = 2 if H % 256 == 0 else 1     # v7x: one H-half per TensorCore
    Hh = H // n_split
    tk_eff = _pick_tile(Fp, MLP_TK)

    h = pl.pallas_call(
        _mlp_fc1_kernel,
        out_shape=jax.ShapeDtypeStruct((N, H), jnp.float32),
        grid=(n_split, Fp // tk_eff),
        in_specs=[
            pl.BlockSpec((N, tk_eff), lambda p, k: (0, k)),
            pl.BlockSpec((tk_eff, Hh), lambda p, k: (k, p)),
            pl.BlockSpec((1, Hh), lambda p, k: (0, p)),
        ],
        out_specs=pl.BlockSpec((N, Hh), lambda p, k: (0, p)),
        scratch_shapes=[pltpu.VMEM((N, Hh), jnp.float32)],
        compiler_params=pltpu.CompilerParams(
            dimension_semantics=("parallel", "arbitrary"),
            vmem_limit_bytes=VMEM_LIMIT),
    )(x, w1p, b1)

    return pl.pallas_call(
        _mlp_fc2_kernel,
        out_shape=jax.ShapeDtypeStruct((N, O), jnp.float32),
        grid=(1,),
        in_specs=[
            pl.BlockSpec((N, H), lambda i: (0, 0)),
            pl.BlockSpec((H, O), lambda i: (0, 0)),
            pl.BlockSpec((1, O), lambda i: (0, 0)),
        ],
        out_specs=pl.BlockSpec((N, O), lambda i: (0, 0)),
        compiler_params=pltpu.CompilerParams(
            dimension_semantics=("arbitrary",),
            vmem_limit_bytes=VMEM_LIMIT),
    )(h, w2, b2)


# --------------------------------------------------------------------------
# One-time parameter prep (outside jit): fold conv+BN, cast, pad w1 once.
# --------------------------------------------------------------------------
def prepare_params(enc_params, mlp_params, mlp_tk=MLP_TK):
    enc_prep = []
    for (w, b, gamma, beta, mean, var) in enc_params:
        Cin, Cout = w.shape[2], w.shape[3]
        sc = gamma / jnp.sqrt(var + BN_EPS)                          # (Cout,)
        Wt = (w.reshape(4 * Cin, Cout) * sc[None, :]).T              # (Cout, K) folded
        sh = (b * sc + beta - mean * sc).reshape(Cout, 1)            # folded shift
        enc_prep.append((Wt.astype(jnp.bfloat16), sh.astype(jnp.float32)))

    w1, b1, w2, b2 = mlp_params
    F, H = w1.shape
    tk_eff = min(mlp_tk, _round_up(F, 128))
    Fp = _round_up(F, tk_eff)
    if Fp != F:  # one-off pad at prep time (not per forward call)
        w1 = jnp.pad(w1, ((0, Fp - F), (0, 0)))
    mlp_prep = (w1.astype(jnp.bfloat16),
                b1.reshape(1, H).astype(jnp.float32),
                w2.astype(jnp.float32),
                b2.reshape(1, -1).astype(jnp.float32))
    return enc_prep, mlp_prep


# --------------------------------------------------------------------------
# Full forward (EncoderMLP, resnet=False, inference mode)
# --------------------------------------------------------------------------
def encoder_mlp_forward(x_nchw, enc_prep, mlp_prep):
    x_cm = jnp.transpose(x_nchw, (1, 0, 2, 3)).astype(jnp.bfloat16)  # NCHW -> CNHW
    for (Wt, sh) in enc_prep:
        Cout = Wt.shape[0]
        X, (N, Hq, Wq) = _im2col_taps_cm(x_cm)
        y = _stage_pallas(X, Wt, sh)                                 # (Cout, M) bf16
        x_cm = y.reshape(Cout, N, Hq, Wq)
    # Dropout(0.3) is identity at inference.
    n = x_cm.shape[1]
    feats = jnp.transpose(x_cm, (1, 0, 2, 3)).reshape(n, -1)         # NCHW flatten
    w1p, b1, w2, b2 = mlp_prep
    # Dropout(0.5) is identity at inference.
    return _mlp_pallas(feats, w1p, b1, w2, b2)                       # (N, 2)


# --------------------------------------------------------------------------
# Pure-JAX f32 reference for correctness checking
# --------------------------------------------------------------------------
def encoder_mlp_reference(x_nchw, enc_params, mlp_params):
    x = jnp.transpose(x_nchw, (0, 2, 3, 1)).astype(jnp.float32)
    for (w, b, gamma, beta, mean, var) in enc_params:
        y = lax.conv_general_dilated(
            x, w, window_strides=(1, 1), padding=((1, 1), (1, 1)),
            dimension_numbers=("NHWC", "HWIO", "NHWC"))
        y = y + b
        inv = gamma / jnp.sqrt(var + BN_EPS)
        y = (y - mean) * inv + beta
        y = jnp.maximum(y, 0.0)
        x = lax.reduce_window(y, -jnp.inf, lax.max,
                              (1, 2, 2, 1), (1, 2, 2, 1), "VALID")
    x = jnp.transpose(x, (0, 3, 1, 2))
    feats = x.reshape(x.shape[0], -1)
    w1, b1, w2, b2 = mlp_params
    h = jnp.maximum(feats @ w1 + b1, 0.0)
    return jax.nn.sigmoid(h @ w2 + b2)


# --------------------------------------------------------------------------
# Deterministic synthetic parameters
# --------------------------------------------------------------------------
def init_encoder_params(key):
    cfgs = [(3, 8), (8, 16), (16, 32)]
    params = []
    for i, (cin, cout) in enumerate(cfgs):
        k = jax.random.fold_in(key, i)
        kw_, kb, kg, kbe, km_, kv = jax.random.split(k, 6)
        w = jax.random.normal(kw_, (2, 2, cin, cout), jnp.float32) / jnp.sqrt(4 * cin)
        b = 0.05 * jax.random.normal(kb, (cout,), jnp.float32)
        gamma = 1.0 + 0.1 * jax.random.normal(kg, (cout,), jnp.float32)
        beta = 0.1 * jax.random.normal(kbe, (cout,), jnp.float32)
        mean = 0.1 * jax.random.normal(km_, (cout,), jnp.float32)
        var = jax.random.uniform(kv, (cout,), jnp.float32, minval=0.5, maxval=1.5)
        params.append((w, b, gamma, beta, mean, var))
    return params


def init_mlp_params(key, in_features, hidden=256, out=2):
    k1, k2, k3, k4 = jax.random.split(key, 4)
    w1 = jax.random.normal(k1, (in_features, hidden), jnp.float32) / jnp.sqrt(in_features)
    b1 = 0.05 * jax.random.normal(k2, (hidden,), jnp.float32)
    w2 = jax.random.normal(k3, (hidden, out), jnp.float32) / jnp.sqrt(hidden)
    b2 = 0.05 * jax.random.normal(k4, (out,), jnp.float32)
    return (w1, b1, w2, b2)


if __name__ == "__main__":
    key = jax.random.PRNGKey(0)
    kx, kp, km = jax.random.split(key, 3)

    # Small test shapes: N=4, 3x32x32 input -> encoder out (4, 32, 4, 4).
    # (The original module's input_features=61952 corresponds to ~350x350
    #  input; here the MLP's in_features is derived from the small input.)
    x = jax.random.normal(kx, (4, 3, 32, 32), jnp.float32)  # NCHW, like PyTorch
    enc_params = init_encoder_params(kp)
    mlp_params = init_mlp_params(km, in_features=32 * 4 * 4)

    enc_prep, mlp_prep = prepare_params(enc_params, mlp_params)

    out = jax.jit(encoder_mlp_forward)(x, enc_prep, mlp_prep)
    out = jax.block_until_ready(out)

    ref = encoder_mlp_reference(x, enc_params, mlp_params)
    assert out.shape == (4, 2), out.shape
    # bf16 MXU operands (per perf review) -> tolerance loosened from 1e-4.
    assert jnp.allclose(out, ref, atol=3e-2), \
        float(jnp.max(jnp.abs(out - ref)))
    print("KERNEL_OK")
</pallas_src>

<mosaic_0001>
module attributes {stable_mosaic.version = 11 : i64} {
  func.func @_stage_kernel(%arg0: i32, %arg1: memref<4x12x1024xbf16, #tpu.memory_space<vmem>>, %arg2: memref<8x12xbf16, #tpu.memory_space<vmem>>, %arg3: memref<8x1xf32, #tpu.memory_space<vmem>>, %arg4: memref<8x1024xbf16, #tpu.memory_space<vmem>>) attributes {dimension_semantics = [#tpu.dimension_semantics<parallel>], iteration_bounds = array<i64: 1>, scalar_prefetch = 0 : i64, scratch_operands = 0 : i64, tpu.core_type = #tpu.core_type<tc>, window_params = [{transform_indices = @transform_0, window_bounds = array<i64: 4, 12, 1024>}, {pipeline_mode = #tpu.pipeline_mode<synchronous>, transform_indices = @transform_1, window_bounds = array<i64: 8, 12>}, {pipeline_mode = #tpu.pipeline_mode<synchronous>, transform_indices = @transform_2, window_bounds = array<i64: 8, 1>}, {transform_indices = @transform_3, window_bounds = array<i64: 8, 1024>}]} {
    %c0 = arith.constant 0 : index
    %c0_0 = arith.constant 0 : index
    %0 = vector.load %arg2[%c0, %c0_0] : memref<8x12xbf16, #tpu.memory_space<vmem>>, vector<8x12xbf16>
    %c0_1 = arith.constant 0 : index
    %c0_2 = arith.constant 0 : index
    %c0_3 = arith.constant 0 : index
    %1 = vector.load %arg1[%c0_1, %c0_2, %c0_3] : memref<4x12x1024xbf16, #tpu.memory_space<vmem>>, vector<1x12x1024xbf16>
    %2 = vector.shape_cast %1 : vector<1x12x1024xbf16> to vector<12x1024xbf16>
    %cst = arith.constant dense<0.000000e+00> : vector<8x1024xf32>
    %3 = tpu.matmul %0, %2, %cst {dimension_numbers = #tpu.dot_dimension_numbers<[1], [0], [0], [1], [0, 0, 1, 1], [], []>} : vector<8x12xbf16>, vector<12x1024xbf16>, vector<8x1024xf32> -> vector<8x1024xf32>
    %c1 = arith.constant 1 : index
    %c0_4 = arith.constant 0 : index
    %c0_5 = arith.constant 0 : index
    %4 = vector.load %arg1[%c1, %c0_4, %c0_5] : memref<4x12x1024xbf16, #tpu.memory_space<vmem>>, vector<1x12x1024xbf16>
    %5 = vector.shape_cast %4 : vector<1x12x1024xbf16> to vector<12x1024xbf16>
    %cst_6 = arith.constant dense<0.000000e+00> : vector<8x1024xf32>
    %6 = tpu.matmul %0, %5, %cst_6 {dimension_numbers = #tpu.dot_dimension_numbers<[1], [0], [0], [1], [0, 0, 1, 1], [], []>} : vector<8x12xbf16>, vector<12x1024xbf16>, vector<8x1024xf32> -> vector<8x1024xf32>
    %7 = arith.maximumf %3, %6 : vector<8x1024xf32>
    %c2 = arith.constant 2 : index
    %c0_7 = arith.constant 0 : index
    %c0_8 = arith.constant 0 : index
    %8 = vector.load %arg1[%c2, %c0_7, %c0_8] : memref<4x12x1024xbf16, #tpu.memory_space<vmem>>, vector<1x12x1024xbf16>
    %9 = vector.shape_cast %8 : vector<1x12x1024xbf16> to vector<12x1024xbf16>
    %cst_9 = arith.constant dense<0.000000e+00> : vector<8x1024xf32>
    %10 = tpu.matmul %0, %9, %cst_9 {dimension_numbers = #tpu.dot_dimension_numbers<[1], [0], [0], [1], [0, 0, 1, 1], [], []>} : vector<8x12xbf16>, vector<12x1024xbf16>, vector<8x1024xf32> -> vector<8x1024xf32>
    %11 = arith.maximumf %7, %10 : vector<8x1024xf32>
    %c3 = arith.constant 3 : index
    %c0_10 = arith.constant 0 : index
    %c0_11 = arith.constant 0 : index
    %12 = vector.load %arg1[%c3, %c0_10, %c0_11] : memref<4x12x1024xbf16, #tpu.memory_space<vmem>>, vector<1x12x1024xbf16>
    %13 = vector.shape_cast %12 : vector<1x12x1024xbf16> to vector<12x1024xbf16>
    %cst_12 = arith.constant dense<0.000000e+00> : vector<8x1024xf32>
    %14 = tpu.matmul %0, %13, %cst_12 {dimension_numbers = #tpu.dot_dimension_numbers<[1], [0], [0], [1], [0, 0, 1, 1], [], []>} : vector<8x12xbf16>, vector<12x1024xbf16>, vector<8x1024xf32> -> vector<8x1024xf32>
    %15 = arith.maximumf %11, %14 : vector<8x1024xf32>
    %c0_13 = arith.constant 0 : index
    %c0_14 = arith.constant 0 : index
    %16 = vector.load %arg3[%c0_13, %c0_14] : memref<8x1xf32, #tpu.memory_space<vmem>>, vector<8x1xf32>
    %17 = vector.broadcast %16 : vector<8x1xf32> to vector<8x1024xf32>
    %18 = arith.addf %15, %17 : vector<8x1024xf32>
    %cst_15 = arith.constant 0.000000e+00 : f32
    %19 = vector.broadcast %cst_15 : f32 to vector<8x1024xf32>
    %20 = arith.maximumf %18, %19 : vector<8x1024xf32>
    %21 = arith.truncf %20 : vector<8x1024xf32> to vector<8x1024xbf16>
    %c0_16 = arith.constant 0 : index
    %c0_17 = arith.constant 0 : index
    %22 = vector.load %arg4[%c0_16, %c0_17] : memref<8x1024xbf16, #tpu.memory_space<vmem>>, vector<8x1024xbf16>
    tpu.vector_store %arg4[%c0_16, %c0_17], %21 {strides = array<i32>} : memref<8x1024xbf16, #tpu.memory_space<vmem>>, vector<8x1024xbf16>,
    return
  }
  func.func @transform_0(%arg0: i32) -> (i32, i32, i32) {
    %c0_i32 = arith.constant 0 : i32
    %c0_i32_0 = arith.constant 0 : i32
    %c0_i32_1 = arith.constant 0 : i32
    return %c0_i32, %c0_i32_0, %arg0 : i32, i32, i32
  }
  func.func @transform_1(%arg0: i32) -> (i32, i32) {
    %c0_i32 = arith.constant 0 : i32
    %c0_i32_0 = arith.constant 0 : i32
    %c0_i32_1 = arith.constant 0 : i32
    return %c0_i32, %c0_i32_0 : i32, i32
  }
  func.func @transform_2(%arg0: i32) -> (i32, i32) {
    %c0_i32 = arith.constant 0 : i32
    %c0_i32_0 = arith.constant 0 : i32
    %c0_i32_1 = arith.constant 0 : i32
    return %c0_i32, %c0_i32_0 : i32, i32
  }
  func.func @transform_3(%arg0: i32) -> (i32, i32) {
    %c0_i32 = arith.constant 0 : i32
    %c0_i32_0 = arith.constant 0 : i32
    return %c0_i32, %arg0 : i32, i32
  }
}

module attributes {stable_mosaic.version = 11 : i64} {
  func.func @_stage_kernel(%arg0: i32, %arg1: memref<4x32x256xbf16, #tpu.memory_space<vmem>>, %arg2: memref<16x32xbf16, #tpu.memory_space<vmem>>, %arg3: memref<16x1xf32, #tpu.memory_space<vmem>>, %arg4: memref<16x256xbf16, #tpu.memory_space<vmem>>) attributes {dimension_semantics = [#tpu.dimension_semantics<parallel>], iteration_bounds = array<i64: 1>, scalar_prefetch = 0 : i64, scratch_operands = 0 : i64, tpu.core_type = #tpu.core_type<tc>, window_params = [{transform_indices = @transform_0, window_bounds = array<i64: 4, 32, 256>}, {pipeline_mode = #tpu.pipeline_mode<synchronous>, transform_indices = @transform_1, window_bounds = array<i64: 16, 32>}, {pipeline_mode = #tpu.pipeline_mode<synchronous>, transform_indices = @transform_2, window_bounds = array<i64: 16, 1>}, {transform_indices = @transform_3, window_bounds = array<i64: 16, 256>}]} {
    %c0 = arith.constant 0 : index
    %c0_0 = arith.constant 0 : index
    %0 = vector.load %arg2[%c0, %c0_0] : memref<16x32xbf16, #tpu.memory_space<vmem>>, vector<16x32xbf16>
    %c0_1 = arith.constant 0 : index
    %c0_2 = arith.constant 0 : index
    %c0_3 = arith.constant 0 : index
    %1 = vector.load %arg1[%c0_1, %c0_2, %c0_3] : memref<4x32x256xbf16, #tpu.memory_space<vmem>>, vector<1x32x256xbf16>
    %2 = vector.shape_cast %1 : vector<1x32x256xbf16> to vector<32x256xbf16>
    %cst = arith.constant dense<0.000000e+00> : vector<16x256xf32>
    %3 = tpu.matmul %0, %2, %cst {dimension_numbers = #tpu.dot_dimension_numbers<[1], [0], [0], [1], [0, 0, 1, 1], [], []>} : vector<16x32xbf16>, vector<32x256xbf16>, vector<16x256xf32> -> vector<16x256xf32>
    %c1 = arith.constant 1 : index
    %c0_4 = arith.constant 0 : index
    %c0_5 = arith.constant 0 : index
    %4 = vector.load %arg1[%c1, %c0_4, %c0_5] : memref<4x32x256xbf16, #tpu.memory_space<vmem>>, vector<1x32x256xbf16>
    %5 = vector.shape_cast %4 : vector<1x32x256xbf16> to vector<32x256xbf16>
    %cst_6 = arith.constant dense<0.000000e+00> : vector<16x256xf32>
    %6 = tpu.matmul %0, %5, %cst_6 {dimension_numbers = #tpu.dot_dimension_numbers<[1], [0], [0], [1], [0, 0, 1, 1], [], []>} : vector<16x32xbf16>, vector<32x256xbf16>, vector<16x256xf32> -> vector<16x256xf32>
    %7 = arith.maximumf %3, %6 : vector<16x256xf32>
    %c2 = arith.constant 2 : index
    %c0_7 = arith.constant 0 : index
    %c0_8 = arith.constant 0 : index
    %8 = vector.load %arg1[%c2, %c0_7, %c0_8] : memref<4x32x256xbf16, #tpu.memory_space<vmem>>, vector<1x32x256xbf16>
    %9 = vector.shape_cast %8 : vector<1x32x256xbf16> to vector<32x256xbf16>
    %cst_9 = arith.constant dense<0.000000e+00> : vector<16x256xf32>
    %10 = tpu.matmul %0, %9, %cst_9 {dimension_numbers = #tpu.dot_dimension_numbers<[1], [0], [0], [1], [0, 0, 1, 1], [], []>} : vector<16x32xbf16>, vector<32x256xbf16>, vector<16x256xf32> -> vector<16x256xf32>
    %11 = arith.maximumf %7, %10 : vector<16x256xf32>
    %c3 = arith.constant 3 : index
    %c0_10 = arith.constant 0 : index
    %c0_11 = arith.constant 0 : index
    %12 = vector.load %arg1[%c3, %c0_10, %c0_11] : memref<4x32x256xbf16, #tpu.memory_space<vmem>>, vector<1x32x256xbf16>
    %13 = vector.shape_cast %12 : vector<1x32x256xbf16> to vector<32x256xbf16>
    %cst_12 = arith.constant dense<0.000000e+00> : vector<16x256xf32>
    %14 = tpu.matmul %0, %13, %cst_12 {dimension_numbers = #tpu.dot_dimension_numbers<[1], [0], [0], [1], [0, 0, 1, 1], [], []>} : vector<16x32xbf16>, vector<32x256xbf16>, vector<16x256xf32> -> vector<16x256xf32>
    %15 = arith.maximumf %11, %14 : vector<16x256xf32>
    %c0_13 = arith.constant 0 : index
    %c0_14 = arith.constant 0 : index
    %16 = vector.load %arg3[%c0_13, %c0_14] : memref<16x1xf32, #tpu.memory_space<vmem>>, vector<16x1xf32>
    %17 = vector.broadcast %16 : vector<16x1xf32> to vector<16x256xf32>
    %18 = arith.addf %15, %17 : vector<16x256xf32>
    %cst_15 = arith.constant 0.000000e+00 : f32
    %19 = vector.broadcast %cst_15 : f32 to vector<16x256xf32>
    %20 = arith.maximumf %18, %19 : vector<16x256xf32>
    %21 = arith.truncf %20 : vector<16x256xf32> to vector<16x256xbf16>
    %c0_16 = arith.constant 0 : index
    %c0_17 = arith.constant 0 : index
    %22 = vector.load %arg4[%c0_16, %c0_17] : memref<16x256xbf16, #tpu.memory_space<vmem>>, vector<16x256xbf16>
    tpu.vector_store %arg4[%c0_16, %c0_17], %21 {strides = array<i32>} : memref<16x256xbf16, #tpu.memory_space<vmem>>, vector<16x256xbf16>,
    return
  }
  func.func @transform_0(%arg0: i32) -> (i32, i32, i32) {
    %c0_i32 = arith.constant 0 : i32
    %c0_i32_0 = arith.constant 0 : i32
    %c0_i32_1 = arith.constant 0 : i32
    return %c0_i32, %c0_i32_0, %arg0 : i32, i32, i32
  }
  func.func @transform_1(%arg0: i32) -> (i32, i32) {
    %c0_i32 = arith.constant 0 : i32
    %c0_i32_0 = arith.constant 0 : i32
    %c0_i32_1 = arith.constant 0 : i32
    return %c0_i32, %c0_i32_0 : i32, i32
  }
  func.func @transform_2(%arg0: i32) -> (i32, i32) {
    %c0_i32 = arith.constant 0 : i32
    %c0_i32_0 = arith.constant 0 : i32
    %c0_i32_1 = arith.constant 0 : i32
    return %c0_i32, %c0_i32_0 : i32, i32
  }
  func.func @transform_3(%arg0: i32) -> (i32, i32) {
    %c0_i32 = arith.constant 0 : i32
    %c0_i32_0 = arith.constant 0 : i32
    return %c0_i32, %arg0 : i32, i32
  }
}

module attributes {stable_mosaic.version = 11 : i64} {
  func.func @_stage_kernel(%arg0: i32, %arg1: memref<4x64x128xbf16, #tpu.memory_space<vmem>>, %arg2: memref<32x64xbf16, #tpu.memory_space<vmem>>, %arg3: memref<32x1xf32, #tpu.memory_space<vmem>>, %arg4: memref<32x128xbf16, #tpu.memory_space<vmem>>) attributes {dimension_semantics = [#tpu.dimension_semantics<parallel>], iteration_bounds = array<i64: 1>, scalar_prefetch = 0 : i64, scratch_operands = 0 : i64, tpu.core_type = #tpu.core_type<tc>, window_params = [{transform_indices = @transform_0, window_bounds = array<i64: 4, 64, 128>}, {pipeline_mode = #tpu.pipeline_mode<synchronous>, transform_indices = @transform_1, window_bounds = array<i64: 32, 64>}, {pipeline_mode = #tpu.pipeline_mode<synchronous>, transform_indices = @transform_2, window_bounds = array<i64: 32, 1>}, {transform_indices = @transform_3, window_bounds = array<i64: 32, 128>}]} {
    %c0 = arith.constant 0 : index
    %c0_0 = arith.constant 0 : index
    %0 = vector.load %arg2[%c0, %c0_0] : memref<32x64xbf16, #tpu.memory_space<vmem>>, vector<32x64xbf16>
    %c0_1 = arith.constant 0 : index
    %c0_2 = arith.constant 0 : index
    %c0_3 = arith.constant 0 : index
    %1 = vector.load %arg1[%c0_1, %c0_2, %c0_3] : memref<4x64x128xbf16, #tpu.memory_space<vmem>>, vector<1x64x128xbf16>
    %2 = vector.shape_cast %1 : vector<1x64x128xbf16> to vector<64x128xbf16>
    %cst = arith.constant dense<0.000000e+00> : vector<32x128xf32>
    %3 = tpu.matmul %0, %2, %cst {dimension_numbers = #tpu.dot_dimension_numbers<[1], [0], [0], [1], [0, 0, 1, 1], [], []>} : vector<32x64xbf16>, vector<64x128xbf16>, vector<32x128xf32> -> vector<32x128xf32>
    %c1 = arith.constant 1 : index
    %c0_4 = arith.constant 0 : index
    %c0_5 = arith.constant 0 : index
    %4 = vector.load %arg1[%c1, %c0_4, %c0_5] : memref<4x64x128xbf16, #tpu.memory_space<vmem>>, vector<1x64x128xbf16>
    %5 = vector.shape_cast %4 : vector<1x64x128xbf16> to vector<64x128xbf16>
    %cst_6 = arith.constant dense<0.000000e+00> : vector<32x128xf32>
    %6 = tpu.matmul %0, %5, %cst_6 {dimension_numbers = #tpu.dot_dimension_numbers<[1], [0], [0], [1], [0, 0, 1, 1], [], []>} : vector<32x64xbf16>, vector<64x128xbf16>, vector<32x128xf32> -> vector<32x128xf32>
    %7 = arith.maximumf %3, %6 : vector<32x128xf32>
    %c2 = arith.constant 2 : index
    %c0_7 = arith.constant 0 : index
    %c0_8 = arith.constant 0 : index
    %8 = vector.load %arg1[%c2, %c0_7, %c0_8] : memref<4x64x128xbf16, #tpu.memory_space<vmem>>, vector<1x64x128xbf16>
    %9 = vector.shape_cast %8 : vector<1x64x128xbf16> to vector<64x128xbf16>
    %cst_9 = arith.constant dense<0.000000e+00> : vector<32x128xf32>
    %10 = tpu.matmul %0, %9, %cst_9 {dimension_numbers = #tpu.dot_dimension_numbers<[1], [0], [0], [1], [0, 0, 1, 1], [], []>} : vector<32x64xbf16>, vector<64x128xbf16>, vector<32x128xf32> -> vector<32x128xf32>
    %11 = arith.maximumf %7, %10 : vector<32x128xf32>
    %c3 = arith.constant 3 : index
    %c0_10 = arith.constant 0 : index
    %c0_11 = arith.constant 0 : index
    %12 = vector.load %arg1[%c3, %c0_10, %c0_11] : memref<4x64x128xbf16, #tpu.memory_space<vmem>>, vector<1x64x128xbf16>
    %13 = vector.shape_cast %12 : vector<1x64x128xbf16> to vector<64x128xbf16>
    %cst_12 = arith.constant dense<0.000000e+00> : vector<32x128xf32>
    %14 = tpu.matmul %0, %13, %cst_12 {dimension_numbers = #tpu.dot_dimension_numbers<[1], [0], [0], [1], [0, 0, 1, 1], [], []>} : vector<32x64xbf16>, vector<64x128xbf16>, vector<32x128xf32> -> vector<32x128xf32>
    %15 = arith.maximumf %11, %14 : vector<32x128xf32>
    %c0_13 = arith.constant 0 : index
    %c0_14 = arith.constant 0 : index
    %16 = vector.load %arg3[%c0_13, %c0_14] : memref<32x1xf32, #tpu.memory_space<vmem>>, vector<32x1xf32>
    %17 = vector.broadcast %16 : vector<32x1xf32> to vector<32x128xf32>
    %18 = arith.addf %15, %17 : vector<32x128xf32>
    %cst_15 = arith.constant 0.000000e+00 : f32
    %19 = vector.broadcast %cst_15 : f32 to vector<32x128xf32>
    %20 = arith.maximumf %18, %19 : vector<32x128xf32>
    %21 = arith.truncf %20 : vector<32x128xf32> to vector<32x128xbf16>
    %c0_16 = arith.constant 0 : index
    %c0_17 = arith.constant 0 : index
    %22 = vector.load %arg4[%c0_16, %c0_17] : memref<32x128xbf16, #tpu.memory_space<vmem>>, vector<32x128xbf16>
    tpu.vector_store %arg4[%c0_16, %c0_17], %21 {strides = array<i32>} : memref<32x128xbf16, #tpu.memory_space<vmem>>, vector<32x128xbf16>,
    return
  }
  func.func @transform_0(%arg0: i32) -> (i32, i32, i32) {
    %c0_i32 = arith.constant 0 : i32
    %c0_i32_0 = arith.constant 0 : i32
    %c0_i32_1 = arith.constant 0 : i32
    return %c0_i32, %c0_i32_0, %arg0 : i32, i32, i32
  }
  func.func @transform_1(%arg0: i32) -> (i32, i32) {
    %c0_i32 = arith.constant 0 : i32
    %c0_i32_0 = arith.constant 0 : i32
    %c0_i32_1 = arith.constant 0 : i32
    return %c0_i32, %c0_i32_0 : i32, i32
  }
  func.func @transform_2(%arg0: i32) -> (i32, i32) {
    %c0_i32 = arith.constant 0 : i32
    %c0_i32_0 = arith.constant 0 : i32
    %c0_i32_1 = arith.constant 0 : i32
    return %c0_i32, %c0_i32_0 : i32, i32
  }
  func.func @transform_3(%arg0: i32) -> (i32, i32) {
    %c0_i32 = arith.constant 0 : i32
    %c0_i32_0 = arith.constant 0 : i32
    return %c0_i32, %arg0 : i32, i32
  }
}

module attributes {stable_mosaic.version = 11 : i64} {
  func.func @_mlp_fc1_kernel(%arg0: i32, %arg1: i32, %arg2: memref<4x512xbf16, #tpu.memory_space<vmem>>, %arg3: memref<512x128xbf16, #tpu.memory_space<vmem>>, %arg4: memref<1x128xf32, #tpu.memory_space<vmem>>, %arg5: memref<4x128xf32, #tpu.memory_space<vmem>>, %arg6: memref<4x128xf32, #tpu.memory_space<vmem>>) attributes {dimension_semantics = [#tpu.dimension_semantics<parallel>, #tpu.dimension_semantics<arbitrary>], iteration_bounds = array<i64: 2, 1>, scalar_prefetch = 0 : i64, scratch_operands = 1 : i64, tpu.core_type = #tpu.core_type<tc>, window_params = [{transform_indices = @transform_0, window_bounds = array<i64: 4, 512>}, {transform_indices = @transform_1, window_bounds = array<i64: 512, 128>}, {transform_indices = @transform_2, window_bounds = array<i64: 1, 128>}, {transform_indices = @transform_3, window_bounds = array<i64: 4, 128>}]} {
    %c0_i32 = arith.constant 0 : i32
    %0 = arith.cmpi eq, %arg1, %c0_i32 : i32
    %1 = arith.extui %0 : i1 to i32
    %c0_i32_0 = arith.constant 0 : i32
    %2 = arith.cmpi ne, %1, %c0_i32_0 : i32
    scf.if %2 {
      %cst_10 = arith.constant 0.000000e+00 : f32
      %12 = vector.broadcast %cst_10 : f32 to vector<4x128xf32>
      %c0_11 = arith.constant 0 : index
      %c0_12 = arith.constant 0 : index
      %13 = vector.load %arg6[%c0_11, %c0_12] : memref<4x128xf32, #tpu.memory_space<vmem>>, vector<4x128xf32>
      tpu.vector_store %arg6[%c0_11, %c0_12], %12 {strides = array<i32>} : memref<4x128xf32, #tpu.memory_space<vmem>>, vector<4x128xf32>,
    } else {
    }
    %c0 = arith.constant 0 : index
    %c0_1 = arith.constant 0 : index
    %3 = vector.load %arg6[%c0, %c0_1] : memref<4x128xf32, #tpu.memory_space<vmem>>, vector<4x128xf32>
    %c0_2 = arith.constant 0 : index
    %c0_3 = arith.constant 0 : index
    %4 = vector.load %arg2[%c0_2, %c0_3] : memref<4x512xbf16, #tpu.memory_space<vmem>>, vector<4x512xbf16>
    %c0_4 = arith.constant 0 : index
    %c0_5 = arith.constant 0 : index
    %5 = vector.load %arg3[%c0_4, %c0_5] : memref<512x128xbf16, #tpu.memory_space<vmem>>, vector<512x128xbf16>
    %cst = arith.constant dense<0.000000e+00> : vector<4x128xf32>
    %6 = tpu.matmul %4, %5, %cst {dimension_numbers = #tpu.dot_dimension_numbers<[1], [0], [0], [1], [0, 0, 1, 1], [], []>} : vector<4x512xbf16>, vector<512x128xbf16>, vector<4x128xf32> -> vector<4x128xf32>
    %7 = arith.addf %3, %6 : vector<4x128xf32>
    %c0_6 = arith.constant 0 : index
    %c0_7 = arith.constant 0 : index
    %8 = vector.load %arg6[%c0_6, %c0_7] : memref<4x128xf32, #tpu.memory_space<vmem>>, vector<4x128xf32>
    tpu.vector_store %arg6[%c0_6, %c0_7], %7 {strides = array<i32>} : memref<4x128xf32, #tpu.memory_space<vmem>>, vector<4x128xf32>,
    %c0_i32_8 = arith.constant 0 : i32
    %9 = arith.cmpi eq, %arg1, %c0_i32_8 : i32
    %10 = arith.extui %9 : i1 to i32
    %c0_i32_9 = arith.constant 0 : i32
    %11 = arith.cmpi ne, %10, %c0_i32_9 : i32
    scf.if %11 {
      %c0_10 = arith.constant 0 : index
      %c0_11 = arith.constant 0 : index
      %12 = vector.load %arg6[%c0_10, %c0_11] : memref<4x128xf32, #tpu.memory_space<vmem>>, vector<4x128xf32>
      %c0_12 = arith.constant 0 : index
      %c0_13 = arith.constant 0 : index
      %13 = vector.load %arg4[%c0_12, %c0_13] : memref<1x128xf32, #tpu.memory_space<vmem>>, vector<1x128xf32>
      %14 = vector.broadcast %13 : vector<1x128xf32> to vector<4x128xf32>
      %15 = arith.addf %12, %14 : vector<4x128xf32>
      %cst_14 = arith.constant 0.000000e+00 : f32
      %16 = vector.broadcast %cst_14 : f32 to vector<4x128xf32>
      %17 = arith.maximumf %15, %16 : vector<4x128xf32>
      %c0_15 = arith.constant 0 : index
      %c0_16 = arith.constant 0 : index
      %18 = vector.load %arg5[%c0_15, %c0_16] : memref<4x128xf32, #tpu.memory_space<vmem>>, vector<4x128xf32>
      tpu.vector_store %arg5[%c0_15, %c0_16], %17 {strides = array<i32>} : memref<4x128xf32, #tpu.memory_space<vmem>>, vector<4x128xf32>,
    } else {
    }
    return
  }
  func.func @transform_0(%arg0: i32, %arg1: i32) -> (i32, i32) {
    %c0_i32 = arith.constant 0 : i32
    %c0_i32_0 = arith.constant 0 : i32
    return %c0_i32, %arg1 : i32, i32
  }
  func.func @transform_1(%arg0: i32, %arg1: i32) -> (i32, i32) {
    %c0_i32 = arith.constant 0 : i32
    return %arg1, %arg0 : i32, i32
  }
  func.func @transform_2(%arg0: i32, %arg1: i32) -> (i32, i32) {
    %c0_i32 = arith.constant 0 : i32
    %c0_i32_0 = arith.constant 0 : i32
    return %c0_i32, %arg0 : i32, i32
  }
  func.func @transform_3(%arg0: i32, %arg1: i32) -> (i32, i32) {
    %c0_i32 = arith.constant 0 : i32
    %c0_i32_0 = arith.constant 0 : i32
    return %c0_i32, %arg0 : i32, i32
  }
}

module attributes {stable_mosaic.version = 11 : i64} {
  func.func @_mlp_fc2_kernel(%arg0: i32, %arg1: memref<4x256xf32, #tpu.memory_space<vmem>>, %arg2: memref<256x2xf32, #tpu.memory_space<vmem>>, %arg3: memref<1x2xf32, #tpu.memory_space<vmem>>, %arg4: memref<4x2xf32, #tpu.memory_space<vmem>>) attributes {dimension_semantics = [#tpu.dimension_semantics<arbitrary>], iteration_bounds = array<i64: 1>, scalar_prefetch = 0 : i64, scratch_operands = 0 : i64, tpu.core_type = #tpu.core_type<tc>, window_params = [{pipeline_mode = #tpu.pipeline_mode<synchronous>, transform_indices = @transform_0, window_bounds = array<i64: 4, 256>}, {pipeline_mode = #tpu.pipeline_mode<synchronous>, transform_indices = @transform_1, window_bounds = array<i64: 256, 2>}, {pipeline_mode = #tpu.pipeline_mode<synchronous>, transform_indices = @transform_2, window_bounds = array<i64: 1, 2>}, {pipeline_mode = #tpu.pipeline_mode<synchronous>, transform_indices = @transform_3, window_bounds = array<i64: 4, 2>}]} {
    %c0 = arith.constant 0 : index
    %c0_0 = arith.constant 0 : index
    %0 = vector.load %arg1[%c0, %c0_0] : memref<4x256xf32, #tpu.memory_space<vmem>>, vector<4x256xf32>
    %c0_1 = arith.constant 0 : index
    %c0_2 = arith.constant 0 : index
    %1 = vector.load %arg2[%c0_1, %c0_2] : memref<256x2xf32, #tpu.memory_space<vmem>>, vector<256x2xf32>
    %cst = arith.constant dense<0.000000e+00> : vector<4x2xf32>
    %2 = tpu.matmul %0, %1, %cst {dimension_numbers = #tpu.dot_dimension_numbers<[1], [0], [0], [1], [0, 0, 1, 1], [], []>} : vector<4x256xf32>, vector<256x2xf32>, vector<4x2xf32> -> vector<4x2xf32>
    %c0_3 = arith.constant 0 : index
    %c0_4 = arith.constant 0 : index
    %3 = vector.load %arg3[%c0_3, %c0_4] : memref<1x2xf32, #tpu.memory_space<vmem>>, vector<1x2xf32>
    %4 = vector.broadcast %3 : vector<1x2xf32> to vector<4x2xf32>
    %5 = arith.addf %2, %4 : vector<4x2xf32>
    %cst_5 = arith.constant 0.000000e+00 : f32
    %6 = vector.broadcast %cst_5 : f32 to vector<4x2xf32>
    %7 = arith.subf %6, %5 : vector<4x2xf32>
    %8 = math.exp %7 : vector<4x2xf32>
    %cst_6 = arith.constant 1.000000e+00 : f32
    %9 = vector.broadcast %cst_6 : f32 to vector<4x2xf32>
    %10 = arith.addf %9, %8 : vector<4x2xf32>
    %cst_7 = arith.constant 1.000000e+00 : f32
    %11 = vector.broadcast %cst_7 : f32 to vector<4x2xf32>
    %12 = arith.divf %11, %10 : vector<4x2xf32>
    %c0_8 = arith.constant 0 : index
    %c0_9 = arith.constant 0 : index
    %13 = vector.load %arg4[%c0_8, %c0_9] : memref<4x2xf32, #tpu.memory_space<vmem>>, vector<4x2xf32>
    tpu.vector_store %arg4[%c0_8, %c0_9], %12 {strides = array<i32>} : memref<4x2xf32, #tpu.memory_space<vmem>>, vector<4x2xf32>,
    return
  }
  func.func @transform_0(%arg0: i32) -> (i32, i32) {
    %c0_i32 = arith.constant 0 : i32
    %c0_i32_0 = arith.constant 0 : i32
    %c0_i32_1 = arith.constant 0 : i32
    return %c0_i32, %c0_i32_0 : i32, i32
  }
  func.func @transform_1(%arg0: i32) -> (i32, i32) {
    %c0_i32 = arith.constant 0 : i32
    %c0_i32_0 = arith.constant 0 : i32
    %c0_i32_1 = arith.constant 0 : i32
    return %c0_i32, %c0_i32_0 : i32, i32
  }
  func.func @transform_2(%arg0: i32) -> (i32, i32) {
    %c0_i32 = arith.constant 0 : i32
    %c0_i32_0 = arith.constant 0 : i32
    %c0_i32_1 = arith.constant 0 : i32
    return %c0_i32, %c0_i32_0 : i32, i32
  }
  func.func @transform_3(%arg0: i32) -> (i32, i32) {
    %c0_i32 = arith.constant 0 : i32
    %c0_i32_0 = arith.constant 0 : i32
    %c0_i32_1 = arith.constant 0 : i32
    return %c0_i32, %c0_i32_0 : i32, i32
  }
}

</mosaic_0001>

<bundles_post_ra>
// kernel: encoder_mlp_forward.5
= control target key start
LH: loop header
LB: loop body
LE: loop exit
PB: predicated region body
PF: predicated region fallthrough
CT: control target
= control target key end

     0   :  { %vm60_vm0 = vcmask 1045504   ;;  %vm56_vm1 = vcmask 97280   ;;  %s1319_s0 = inlined_call_operand.vmem [shape: bf16[4,12,1024], index: 0, kind: input, shape index: {}]   ;;  %s1320_s1 = inlined_call_operand.vmem [shape: bf16[8,12], index: 1, kind: input, shape index: {}]   ;;  %s1321_s2 = inlined_call_operand.vmem [shape: f32[8,1], index: 2, kind: input, shape index: {}]   ;;  %s1322_s3 = inlined_call_operand.vmem [shape: bf16[8,1024], index: 3, kind: output, shape index: {}]  }
   0x1   :  { %v756_v0 = vld [vmem:[%s1319_s0] sm:$0xf]  ;;  %v938_v2 = vld [vmem:[%s1319_s0 + $0x4] sm:$0xf]  ;;  %v764_v5 = vld [vmem:[%s1319_s0 + $0x8] sm:$0xf] }
   0x2   :  { %v942_v1 = vld [vmem:[%s1319_s0 + $0x1c] sm:$0x30]  ;;  %v758_v4 = vld [vmem:[%s1319_s0 + $0x20] sm:$0x30]  ;;  %v943_v6 = vld [vmem:[%s1319_s0 + $0x24] sm:$0x30] }
   0x3   :  { %v757_v3 = vor.u32 %v942_v1, %v756_v0  ;;  %v761_v7 = vor.u32 %v938_v2, %v758_v4  ;;  %v765_v8 = vor.u32 %v943_v6, %v764_v5  ;;  %v939_v9 = vld [vmem:[%s1319_s0 + $0xc] sm:$0xf]  ;;  %v1020_v11 = vld [vmem:[%s1320_s1] sm:$0xf]  ;;  %v780_v14 = vld [vmem:[%s1319_s0 + $0x18] sm:$0xf] }
   0x4   :  { %v766_v10 = vld [vmem:[%s1319_s0 + $0x28] sm:$0x30]  ;;  %v945_v15 = vld [vmem:[%s1319_s0 + $0x34] sm:$0x30]  ;;  %v941_v19 = vld [vmem:[%s1319_s0 + $0x1c] sm:$0xf] }
   0x5   :  { %v62_v12 = vsel %vm60_vm0, %v757_v3, 0  ;;  %v769_v13 = vor.u32 %v939_v9, %v766_v10  ;;  %v65_v16 = vsel %vm60_vm0, %v761_v7, 0  ;;  %v68_v17 = vsel %vm60_vm0, %v765_v8, 0  ;;  %v782_v20 = vld [vmem:[%s1319_s0 + $0x38] sm:$0x30] }
   0x6   :  { %92 = vmatpush.bf16.msra.mxu0 %v62_v12  ;;  %v781_v18 = vor.u32 %v945_v15, %v780_v14  ;;  %105 = vmatpush.bf16.msra.mxu1 %v65_v16  ;;  %v785_v22 = vor.u32 %v941_v19, %v782_v20  ;;  %v772_v23 = vld [vmem:[%s1319_s0 + $0x10] sm:$0xf]  ;;  %v940_v27 = vld [vmem:[%s1319_s0 + $0x14] sm:$0xf]  ;;  %v812_v31 = vld [vmem:[%s1319_s0 + $0x48] sm:$0xf] }
   0x7   :  { %118 = vmatpush.bf16.msra.mxu2 %v68_v17  ;;  %v71_v21 = vsel %vm60_vm0, %v769_v13, 0  ;;  %v944_v24 = vld [vmem:[%s1319_s0 + $0x2c] sm:$0x30]  ;;  %v774_v28 = vld [vmem:[%s1319_s0 + $0x30] sm:$0x30] }
   0x8   :  { %131 = vmatpush.bf16.msra.mxu3 %v71_v21  ;;  %v80_v25 = vsel %vm60_vm0, %v781_v18, 0  ;;  %v773_v26 = vor.u32 %v944_v24, %v772_v23  ;;  %v83_v29 = vsel %vm60_vm0, %v785_v22, 0  ;;  %v777_v30 = vor.u32 %v940_v27, %v774_v28  ;;  %v951_v32 = vld [vmem:[%s1319_s0 + $0x64] sm:$0x30]  ;;  %v947_v35 = vld [vmem:[%s1319_s0 + $0x4c] sm:$0xf] }
   0x9   :  { %786 = vmatmul.msk.bf16.vlgmr.msra.gmra.mxu0 %vm56_vm1, %v1020_v11  ;;  %787 = vmatmul.msk.bf16.vlgmr.msra.gmra.mxu1 %vm56_vm1, %v1020_v11  ;;  %v813_v34 = vor.u32 %v951_v32, %v812_v31  ;;  %v814_v36 = vld [vmem:[%s1319_s0 + $0x68] sm:$0x30]  ;;  %v804_v39 = vld [vmem:[%s1319_s0 + $0x40] sm:$0xf]  ;;  %v946_v43 = vld [vmem:[%s1319_s0 + $0x44] sm:$0xf] }
   0xa   :  { %788 = vmatmul.msk.bf16.vlgmr.msra.gmra.mxu2 %vm56_vm1, %v1020_v11  ;;  %v74_v33 = vsel %vm60_vm0, %v773_v26, 0  ;;  %v77_v37 = vsel %vm60_vm0, %v777_v30, 0  ;;  %v817_v38 = vor.u32 %v947_v35, %v814_v36  ;;  %v950_v40 = vld [vmem:[%s1319_s0 + $0x5c] sm:$0x30]  ;;  %v806_v44 = vld [vmem:[%s1319_s0 + $0x60] sm:$0x30] }
   0xb   :  { %170 = vmatpush.bf16.msrb.mxu2 %v80_v25  ;;  %789 = vmatmul.msk.bf16.vlgmr.msra.gmra.mxu3 %vm56_vm1, %v1020_v11  ;;  %v237_v41 = vsel %vm60_vm0, %v813_v34, 0  ;;  %v805_v42 = vor.u32 %v950_v40, %v804_v39  ;;  %v809_v46 = vor.u32 %v946_v43, %v806_v44  ;;  %v828_v49 = vld [vmem:[%s1319_s0 + $0x58] sm:$0xf]  ;;  %v949_v51 = vld [vmem:[%s1319_s0 + $0x5c] sm:$0xf] }
   0xc   :  { %144 = vmatpush.bf16.msrb.mxu0 %v74_v33  ;;  %183 = vmatpush.bf16.msrb.mxu3 %v83_v29  ;;  %v240_v45 = vsel %vm60_vm0, %v817_v38, 0  ;;  %v953_v50 = vld [vmem:[%s1319_s0 + $0x74] sm:$0x30]  ;;  %v830_v52 = vld [vmem:[%s1319_s0 + $0x78] sm:$0x30] }
   0xd   :  { %157 = vmatpush.bf16.msrb.mxu1 %v77_v37  ;;  %v231_v47 = vsel %vm60_vm0, %v805_v42, 0  ;;  %v234_v48 = vsel %vm60_vm0, %v809_v46, 0  ;;  %v820_v53 = vld [vmem:[%s1319_s0 + $0x50] sm:$0xf]  ;;  %v948_v55 = vld [vmem:[%s1319_s0 + $0x54] sm:$0xf]  ;;  %v829_v57 = vor.u32 %v953_v50, %v828_v49  ;;  %v833_v58 = vor.u32 %v949_v51, %v830_v52 }
   0xe   :  { %v952_v54 = vld [vmem:[%s1319_s0 + $0x6c] sm:$0x30]  ;;  %v822_v56 = vld [vmem:[%s1319_s0 + $0x70] sm:$0x30]  ;;  %v860_v1 = vld [vmem:[%s1319_s0 + $0x88] sm:$0xf] }
   0xf   :  { %287 = vmatpush.bf16.msra.mxu2 %v237_v41  ;;  %v821_v59 = vor.u32 %v952_v54, %v820_v53  ;;  %v825_v60 = vor.u32 %v948_v55, %v822_v56  ;;  %v249_v61 = vsel %vm60_vm0, %v829_v57, 0  ;;  %v252_v62 = vsel %vm60_vm0, %v833_v58, 0  ;;  %v959_v2 = vld [vmem:[%s1319_s0 + $0xa4] sm:$0x30]  ;;  %v955_v3 = vld [vmem:[%s1319_s0 + $0x8c] sm:$0xf] }
  0x10   :  { %300 = vmatpush.bf16.msra.mxu3 %v240_v45  ;;  %261 = vmatpush.bf16.msra.mxu0 %v231_v47  ;;  %v862_v4 = vld [vmem:[%s1319_s0 + $0xa8] sm:$0x30]  ;;  %v852_v5 = vld [vmem:[%s1319_s0 + $0x80] sm:$0xf]  ;;  %v954_v7 = vld [vmem:[%s1319_s0 + $0x84] sm:$0xf]  ;;  %v861_v9 = vor.u32 %v959_v2, %v860_v1 }
  0x11   :  { %274 = vmatpush.bf16.msra.mxu1 %v234_v48  ;;  %v243_v63 = vsel %vm60_vm0, %v821_v59, 0  ;;  %v246_v0 = vsel %vm60_vm0, %v825_v60, 0  ;;  %v958_v6 = vld [vmem:[%s1319_s0 + $0x9c] sm:$0x30]  ;;  %v854_v8 = vld [vmem:[%s1319_s0 + $0xa0] sm:$0x30]  ;;  %v865_v10 = vor.u32 %v955_v3, %v862_v4 }
  0x12   :  { %v853_v12 = vor.u32 %v958_v6, %v852_v5  ;;  %v857_v13 = vor.u32 %v954_v7, %v854_v8  ;;  %v414_v14 = vsel %vm60_vm0, %v861_v9, 0  ;;  %v876_v18 = vld [vmem:[%s1319_s0 + $0x98] sm:$0xf]  ;;  %v957_v20 = vld [vmem:[%s1319_s0 + $0x9c] sm:$0xf]  ;;  %v720_v50 = vld [vmem:[%s1321_s2] sm:$0xff] }
  0x13   :  { %v417_v15 = vsel %vm60_vm0, %v865_v10, 0  ;;  %v961_v19 = vld [vmem:[%s1319_s0 + $0xb4] sm:$0x30]  ;;  %v878_v21 = vld [vmem:[%s1319_s0 + $0xb8] sm:$0x30]  ;;  %v972_v51 = vmov 0  }
  0x14   :  { %v408_v16 = vsel %vm60_vm0, %v853_v12, 0  ;;  %v411_v17 = vsel %vm60_vm0, %v857_v13, 0  ;;  %v868_v22 = vld [vmem:[%s1319_s0 + $0x90] sm:$0xf]  ;;  %v956_v24 = vld [vmem:[%s1319_s0 + $0x94] sm:$0xf]  ;;  %v877_v26 = vor.u32 %v961_v19, %v876_v18  ;;  %v881_v27 = vor.u32 %v957_v20, %v878_v21  ;;  %971 = vset.pattern.permute.xlu0 %v972_v51 }
  0x15   :  { %v960_v23 = vld [vmem:[%s1319_s0 + $0xac] sm:$0x30]  ;;  %v870_v25 = vld [vmem:[%s1319_s0 + $0xb0] sm:$0x30]  ;;  %v908_v34 = vld [vmem:[%s1319_s0 + $0xc8] sm:$0xf]  ;;  %723 = vperm.xlu0 %971, %v720_v50  }
  0x16   :  { %v869_v28 = vor.u32 %v960_v23, %v868_v22  ;;  %v873_v29 = vor.u32 %v956_v24, %v870_v25  ;;  %v426_v30 = vsel %vm60_vm0, %v877_v26, 0  ;;  %v429_v31 = vsel %vm60_vm0, %v881_v27, 0  ;;  %v967_v35 = vld [vmem:[%s1319_s0 + $0xe4] sm:$0x30]  ;;  %v963_v36 = vld [vmem:[%s1319_s0 + $0xcc] sm:$0xf] }
  0x17   :  { %v910_v37 = vld [vmem:[%s1319_s0 + $0xe8] sm:$0x30]  ;;  %v900_v38 = vld [vmem:[%s1319_s0 + $0xc0] sm:$0xf]  ;;  %v962_v40 = vld [vmem:[%s1319_s0 + $0xc4] sm:$0xf]  ;;  %v909_v42 = vor.u32 %v967_v35, %v908_v34 }
  0x18   :  { %v420_v32 = vsel %vm60_vm0, %v869_v28, 0  ;;  %v423_v33 = vsel %vm60_vm0, %v873_v29, 0  ;;  %v966_v39 = vld [vmem:[%s1319_s0 + $0xdc] sm:$0x30]  ;;  %v902_v41 = vld [vmem:[%s1319_s0 + $0xe0] sm:$0x30]  ;;  %v913_v43 = vor.u32 %v963_v36, %v910_v37 }
  0x19   :  { %790 = vmatmul.msk.bf16.vlgmr.msrb.gmra.mxu0 %vm56_vm1, %v1020_v11  ;;  %791 = vmatmul.msk.bf16.vlgmr.msrb.gmra.mxu1 %vm56_vm1, %v1020_v11  ;;  %v901_v44 = vor.u32 %v966_v39, %v900_v38  ;;  %v905_v45 = vor.u32 %v962_v40, %v902_v41  ;;  %v591_v46 = vsel %vm60_vm0, %v909_v42, 0  ;;  %v924_v52 = vld [vmem:[%s1319_s0 + $0xd8] sm:$0xf]  ;;  %v965_v54 = vld [vmem:[%s1319_s0 + $0xdc] sm:$0xf] }
  0x1a   :  { %792 = vmatmul.msk.bf16.vlgmr.msrb.gmra.mxu2 %vm56_vm1, %v1020_v11  ;;  %313 = vmatpush.bf16.msrb.mxu0 %v243_v63  ;;  %v594_v47 = vsel %vm60_vm0, %v913_v43, 0  ;;  %v969_v53 = vld [vmem:[%s1319_s0 + $0xf4] sm:$0x30]  ;;  %v926_v55 = vld [vmem:[%s1319_s0 + $0xf8] sm:$0x30] }
  0x1b   :  { %793 = vmatmul.msk.bf16.vlgmr.msrb.gmra.mxu3 %vm56_vm1, %v1020_v11  ;;  %339 = vmatpush.bf16.msrb.mxu2 %v249_v61  ;;  %v585_v48 = vsel %vm60_vm0, %v901_v44, 0  ;;  %v588_v49 = vsel %vm60_vm0, %v905_v45, 0  ;;  %v916_v56 = vld [vmem:[%s1319_s0 + $0xd0] sm:$0xf]  ;;  %v964_v58 = vld [vmem:[%s1319_s0 + $0xd4] sm:$0xf]  ;;  %v925_v60 = vor.u32 %v969_v53, %v924_v52  ;;  %v929_v61 = vor.u32 %v965_v54, %v926_v55 }
  0x1c   :  { %352 = vmatpush.bf16.msrb.mxu3 %v252_v62  ;;  %326 = vmatpush.bf16.msrb.mxu1 %v246_v0  ;;  %v968_v57 = vld [vmem:[%s1319_s0 + $0xec] sm:$0x30]  ;;  %v918_v59 = vld [vmem:[%s1319_s0 + $0xf0] sm:$0x30] }
  0x1d   :  { %v917_v62 = vor.u32 %v968_v57, %v916_v56  ;;  %v921_v63 = vor.u32 %v964_v58, %v918_v59  ;;  %v603_v0 = vsel %vm60_vm0, %v925_v60, 0  ;;  %v606_v1 = vsel %vm60_vm0, %v929_v61, 0 }
  0x1f   :  { %v597_v2 = vsel %vm60_vm0, %v917_v62, 0  ;;  %v600_v3 = vsel %vm60_vm0, %v921_v63, 0 }
  0x29   :  { %834 = vmatmul.msk.bf16.vlgmr.msra.gmra.mxu0 %vm56_vm1, %v1020_v11  ;;  %835 = vmatmul.msk.bf16.vlgmr.msra.gmra.mxu1 %vm56_vm1, %v1020_v11 }
  0x2a   :  { %836 = vmatmul.msk.bf16.vlgmr.msra.gmra.mxu2 %vm56_vm1, %v1020_v11  ;;  %438 = vmatpush.bf16.msra.mxu0 %v408_v16 }
  0x2b   :  { %837 = vmatmul.msk.bf16.vlgmr.msra.gmra.mxu3 %vm56_vm1, %v1020_v11  ;;  %464 = vmatpush.bf16.msra.mxu2 %v414_v14 }
  0x2c   :  { %477 = vmatpush.bf16.msra.mxu3 %v417_v15  ;;  %451 = vmatpush.bf16.msra.mxu1 %v411_v17 }
  0x39   :  { %838 = vmatmul.msk.bf16.vlgmr.msrb.gmra.mxu0 %vm56_vm1, %v1020_v11  ;;  %839 = vmatmul.msk.bf16.vlgmr.msrb.gmra.mxu1 %vm56_vm1, %v1020_v11 }
  0x3a   :  { %840 = vmatmul.msk.bf16.vlgmr.msrb.gmra.mxu2 %vm56_vm1, %v1020_v11  ;;  %490 = vmatpush.bf16.msrb.mxu0 %v420_v32 }
  0x3b   :  { %841 = vmatmul.msk.bf16.vlgmr.msrb.gmra.mxu3 %vm56_vm1, %v1020_v11  ;;  %516 = vmatpush.bf16.msrb.mxu2 %v426_v30 }
  0x3c   :  { %529 = vmatpush.bf16.msrb.mxu3 %v429_v31  ;;  %503 = vmatpush.bf16.msrb.mxu1 %v423_v33 }
  0x49   :  { %882 = vmatmul.msk.bf16.vlgmr.msra.gmra.mxu0 %vm56_vm1, %v1020_v11  ;;  %883 = vmatmul.msk.bf16.vlgmr.msra.gmra.mxu1 %vm56_vm1, %v1020_v11 }
  0x4a   :  { %884 = vmatmul.msk.bf16.vlgmr.msra.gmra.mxu2 %vm56_vm1, %v1020_v11  ;;  %615 = vmatpush.bf16.msra.mxu0 %v585_v48 }
  0x4b   :  { %885 = vmatmul.msk.bf16.vlgmr.msra.gmra.mxu3 %vm56_vm1, %v1020_v11  ;;  %641 = vmatpush.bf16.msra.mxu2 %v591_v46 }
  0x4c   :  { %654 = vmatpush.bf16.msra.mxu3 %v594_v47  ;;  %628 = vmatpush.bf16.msra.mxu1 %v588_v49 }
  0x59   :  { %886 = vmatmul.msk.bf16.vlgmr.msrb.gmra.mxu0 %vm56_vm1, %v1020_v11  ;;  %887 = vmatmul.msk.bf16.vlgmr.msrb.gmra.mxu1 %vm56_vm1, %v1020_v11 }
  0x5a   :  { %888 = vmatmul.msk.bf16.vlgmr.msrb.gmra.mxu2 %vm56_vm1, %v1020_v11  ;;  %667 = vmatpush.bf16.msrb.mxu0 %v597_v2 }
  0x5b   :  { %889 = vmatmul.msk.bf16.vlgmr.msrb.gmra.mxu3 %vm56_vm1, %v1020_v11  ;;  %693 = vmatpush.bf16.msrb.mxu2 %v603_v0 }
  0x5c   :  { %706 = vmatpush.bf16.msrb.mxu3 %v606_v1  ;;  %680 = vmatpush.bf16.msrb.mxu1 %v600_v3 }
  0x69   :  { %930 = vmatmul.msk.bf16.vlgmr.msra.gmra.mxu0 %vm56_vm1, %v1020_v11  ;;  %931 = vmatmul.msk.bf16.vlgmr.msra.gmra.mxu1 %vm56_vm1, %v1020_v11 }
  0x6a   :  { %932 = vmatmul.msk.bf16.vlgmr.msra.gmra.mxu2 %vm56_vm1, %v1020_v11 }
  0x6b   :  { %933 = vmatmul.msk.bf16.vlgmr.msra.gmra.mxu3 %vm56_vm1, %v1020_v11 }
  0x79   :  { %934 = vmatmul.msk.bf16.vlgmr.msrb.gmra.mxu0 %vm56_vm1, %v1020_v11  ;;  %935 = vmatmul.msk.bf16.vlgmr.msrb.gmra.mxu1 %vm56_vm1, %v1020_v11 }
  0x7a   :  { %936 = vmatmul.msk.bf16.vlgmr.msrb.gmra.mxu2 %vm56_vm1, %v1020_v11 }
  0x7b   :  { %937 = vmatmul.msk.bf16.vlgmr.msrb.gmra.mxu3 %vm56_vm1, %v1020_v11 }
  0x86   :  { %v94_v4 = vpop.f32.mrf.mxu0  ;;  %v107_v5 = vpop.f32.mrf.mxu1 }
  0x87   :  { %v724_v54 = vpop.permute.xlu0 %723 }
  0x8d   :  { %v120_v6 = vpop.f32.mrf.mxu2 }
  0x8e   :  { %v133_v7 = vpop.f32.mrf.mxu3  ;;  %v96_v8 = vpop.f32.mrf.mxu0 }
  0x8f   :  { %v109_v9 = vpop.f32.mrf.mxu1 }
  0x95   :  { %v122_v10 = vpop.f32.mrf.mxu2 }
  0x96   :  { %v135_v12 = vpop.f32.mrf.mxu3  ;;  %v1289_v13 = vpop.f32.mrf.mxu0 }
  0x97   :  { %v1291_v14 = vpop.f32.mrf.mxu1 }
  0x9d   :  { %v1293_v15 = vpop.f32.mrf.mxu2 }
  0x9e   :  { %v1295_v16 = vpop.f32.mrf.mxu3  ;;  %v148_v17 = vpop.f32.mrf.mxu0 }
  0x9f   :  { %v161_v18 = vpop.f32.mrf.mxu1 }
  0xa5   :  { %v174_v19 = vpop.f32.mrf.mxu2 }
  0xa6   :  { %v187_v11 = vpop.f32.mrf.mxu3  ;;  %v263_v20 = vpop.f32.mrf.mxu0 }
  0xa7   :  { %v276_v21 = vpop.f32.mrf.mxu1  ;;  %v358_v50 = vmax.f32 %v94_v4, %v263_v20 }
  0xa8   :  { %v359_v51 = vmax.f32 %v107_v5, %v276_v21 }
  0xad   :  { %v289_v22 = vpop.f32.mrf.mxu2 }
  0xae   :  { %v302_v23 = vpop.f32.mrf.mxu3  ;;  %v265_v24 = vpop.f32.mrf.mxu0  ;;  %v360_v62 = vmax.f32 %v120_v6, %v289_v22 }
  0xaf   :  { %v278_v25 = vpop.f32.mrf.mxu1  ;;  %v361_v0 = vmax.f32 %v133_v7, %v302_v23 }
  0xb5   :  { %v291_v26 = vpop.f32.mrf.mxu2 }
  0xb6   :  { %v304_v27 = vpop.f32.mrf.mxu3  ;;  %v315_v28 = vpop.f32.mrf.mxu0 }
  0xb7   :  { %v328_v29 = vpop.f32.mrf.mxu1  ;;  %v362_v7 = vmax.f32 %v1289_v13, %v315_v28 }
  0xb8   :  { %v363_v21 = vmax.f32 %v1291_v14, %v328_v29 }
  0xbd   :  { %v1297_v30 = vpop.f32.mrf.mxu2 }
  0xbe   :  { %v1299_v31 = vpop.f32.mrf.mxu3  ;;  %v317_v32 = vpop.f32.mrf.mxu0  ;;  %v364_v13 = vmax.f32 %v1293_v15, %v1297_v30 }
  0xbf   :  { %v330_v33 = vpop.f32.mrf.mxu1  ;;  %v365_v14 = vmax.f32 %v1295_v16, %v1299_v31 }
  0xc5   :  { %v343_v34 = vpop.f32.mrf.mxu2 }
  0xc6   :  { %v356_v35 = vpop.f32.mrf.mxu3  ;;  %v440_v36 = vpop.f32.mrf.mxu0 }
  0xc7   :  { %v453_v37 = vpop.f32.mrf.mxu1  ;;  %v535_v52 = vmax.f32 %v358_v50, %v440_v36 }
  0xc8   :  { %v536_v55 = vmax.f32 %v359_v51, %v453_v37 }
  0xcd   :  { %v466_v38 = vpop.f32.mrf.mxu2 }
  0xce   :  { %v479_v39 = vpop.f32.mrf.mxu3  ;;  %v442_v40 = vpop.f32.mrf.mxu0  ;;  %v537_v2 = vmax.f32 %v360_v62, %v466_v38 }
  0xcf   :  { %v455_v41 = vpop.f32.mrf.mxu1  ;;  %v538_v8 = vmax.f32 %v361_v0, %v479_v39 }
  0xd5   :  { %v468_v42 = vpop.f32.mrf.mxu2 }
  0xd6   :  { %v481_v43 = vpop.f32.mrf.mxu3  ;;  %v492_v44 = vpop.f32.mrf.mxu0 }
  0xd7   :  { %v505_v45 = vpop.f32.mrf.mxu1  ;;  %v539_v22 = vmax.f32 %v362_v7, %v492_v44 }
  0xd8   :  { %v540_v25 = vmax.f32 %v363_v21, %v505_v45 }
  0xdd   :  { %v518_v46 = vpop.f32.mrf.mxu2 }
  0xde   :  { %v531_v47 = vpop.f32.mrf.mxu3  ;;  %v494_v48 = vpop.f32.mrf.mxu0  ;;  %v541_v36 = vmax.f32 %v364_v13, %v518_v46 }
  0xdf   :  { %v507_v49 = vpop.f32.mrf.mxu1  ;;  %v542_v38 = vmax.f32 %v365_v14, %v531_v47 }
  0xe5   :  { %v520_v53 = vpop.f32.mrf.mxu2 }
  0xe6   :  { %v533_v56 = vpop.f32.mrf.mxu3  ;;  %v617_v57 = vpop.f32.mrf.mxu0 }
  0xe7   :  { %v712_v58 = vmax.f32 %v535_v52, %v617_v57  ;;  %v630_v59 = vpop.f32.mrf.mxu1 }
  0xe8   :  { %v713_v60 = vmax.f32 %v536_v55, %v630_v59 }
  0xe9   :  { %v726_v61 = vadd.f32 %v724_v54, %v712_v58 }
  0xea   :  { %v727_v63 = vadd.f32 %v724_v54, %v713_v60 }
  0xeb   :  { %v734_v1 = vmax.f32 %v726_v61, 0.0 }
  0xec   :  { %v735_v3 = vmax.f32 %v727_v63, 0.0 }
  0xed   :  { %v643_v9 = vpop.f32.mrf.mxu2 }
  0xee   :  { %v714_v4 = vmax.f32 %v537_v2, %v643_v9  ;;  %v656_v5 = vpop.f32.mrf.mxu3  ;;  %v742_v10 = vpack.c.bf16 %v735_v3, %v734_v1  ;;  %v619_v12 = vpop.f32.mrf.mxu0 }
  0xef   :  { %v715_v17 = vmax.f32 %v538_v8, %v656_v5  ;;  %v632_v18 = vpop.f32.mrf.mxu1 }
  0xf0   :  { %v728_v19 = vadd.f32 %v724_v54, %v714_v4  ;;  %746 = vst [vmem:[%s1322_s3] sm:$0xff] %v742_v10 }
  0xf1   :  { %v729_v11 = vadd.f32 %v724_v54, %v715_v17 }
  0xf2   :  { %v736_v6 = vmax.f32 %v728_v19, 0.0 }
  0xf3   :  { %v737_v20 = vmax.f32 %v729_v11, 0.0 }
  0xf5   :  { %v743_v23 = vpack.c.bf16 %v737_v20, %v736_v6  ;;  %v645_v24 = vpop.f32.mrf.mxu2 }
  0xf6   :  { %v658_v26 = vpop.f32.mrf.mxu3  ;;  %v669_v27 = vpop.f32.mrf.mxu0 }
  0xf7   :  { %747 = vst [vmem:[%s1322_s3 + $0x8] sm:$0xff] %v743_v23  ;;  %v716_v32 = vmax.f32 %v539_v22, %v669_v27  ;;  %v682_v33 = vpop.f32.mrf.mxu1 }
  0xf8   :  { %v717_v34 = vmax.f32 %v540_v25, %v682_v33 }
  0xf9   :  { %v730_v35 = vadd.f32 %v724_v54, %v716_v32 }
  0xfa   :  { %v731_v28 = vadd.f32 %v724_v54, %v717_v34 }
  0xfb   :  { %v738_v29 = vmax.f32 %v730_v35, 0.0 }
  0xfc   :  { %v739_v37 = vmax.f32 %v731_v28, 0.0 }
  0xfd   :  { %v695_v39 = vpop.f32.mrf.mxu2 }
  0xfe   :  { %v744_v40 = vpack.c.bf16 %v739_v37, %v738_v29  ;;  %v718_v41 = vmax.f32 %v541_v36, %v695_v39  ;;  %v708_v42 = vpop.f32.mrf.mxu3  ;;  %v671_v43 = vpop.f32.mrf.mxu0 }
  0xff   :  { %v719_v44 = vmax.f32 %v542_v38, %v708_v42  ;;  %v684_v45 = vpop.f32.mrf.mxu1 }
 0x100   :  { %748 = vst [vmem:[%s1322_s3 + $0x10] sm:$0xff] %v744_v40  ;;  %v732_v15 = vadd.f32 %v724_v54, %v718_v41 }
 0x101   :  { %v733_v30 = vadd.f32 %v724_v54, %v719_v44 }
 0x102   :  { %v740_v48 = vmax.f32 %v732_v15, 0.0 }
 0x103   :  { %v741_v49 = vmax.f32 %v733_v30, 0.0 }
 0x105   :  { %v745_v16 = vpack.c.bf16 %v741_v49, %v740_v48  ;;  %v697_v31 = vpop.f32.mrf.mxu2 }
 0x106   :  { %v710_v46 = vpop.f32.mrf.mxu3 }
 0x107   :  { %749 = vst [vmem:[%s1322_s3 + $0x18] sm:$0xff] %v745_v16 }

// kernel: encoder_mlp_forward.6
= control target key start
LH: loop header
LB: loop body
LE: loop exit
PB: predicated region body
PF: predicated region fallthrough
CT: control target
= control target key end

     0   :  { %v384_v3 = vmov 0   ;;  %vm46_vm0 = vcmask 261120   ;;  %s524_s0 = inlined_call_operand.vmem [shape: bf16[4,32,256], index: 0, kind: input, shape index: {}]   ;;  %s525_s1 = inlined_call_operand.vmem [shape: bf16[16,32], index: 1, kind: input, shape index: {}]   ;;  %s526_s2 = inlined_call_operand.vmem [shape: f32[16,1], index: 2, kind: input, shape index: {}]   ;;  %s527_s3 = inlined_call_operand.vmem [shape: bf16[16,256], index: 3, kind: output, shape index: {}]  }
   0x1   :  { %v291_v0 = vld [vmem:[%s524_s0 + $0x10] sm:$0xf]  ;;  %v369_v1 = vld [vmem:[%s524_s0 + $0x14] sm:$0xf0]  ;;  %v368_v2 = vld [vmem:[%s524_s0 + $0x14] sm:$0xf]  ;;  %383 = vset.pattern.permute.xlu0 %v384_v3 }
   0x2   :  { %v292_v4 = vor.u32 %v369_v1, %v291_v0  ;;  %v293_v5 = vld [vmem:[%s524_s0 + $0x18] sm:$0xf0]  ;;  %v313_v6 = vld [vmem:[%s524_s0 + $0x30] sm:$0xf]  ;;  %v373_v7 = vld [vmem:[%s524_s0 + $0x34] sm:$0xf0] }
   0x3   :  { %v296_v8 = vor.u32 %v368_v2, %v293_v5  ;;  %v314_v9 = vor.u32 %v373_v7, %v313_v6  ;;  %v372_v10 = vld [vmem:[%s524_s0 + $0x34] sm:$0xf]  ;;  %v315_v11 = vld [vmem:[%s524_s0 + $0x38] sm:$0xf0]  ;;  %v283_v12 = vld [vmem:[%s524_s0] sm:$0xf] }
   0x4   :  { %56 = vmatpush.bf16.msra.mxu0 %v292_v4  ;;  %v318_v13 = vor.u32 %v372_v10, %v315_v11  ;;  %v367_v14 = vld [vmem:[%s524_s0 + $0x4] sm:$0xf0]  ;;  %v366_v15 = vld [vmem:[%s524_s0 + $0x4] sm:$0xf]  ;;  %v285_v16 = vld [vmem:[%s524_s0 + $0x8] sm:$0xf0] }
   0x5   :  { %70 = vmatpush.bf16.msra.mxu1 %v296_v8  ;;  %109 = vmatpush.bf16.msra.mxu2 %v314_v9  ;;  %v284_v17 = vor.u32 %v367_v14, %v283_v12  ;;  %v288_v18 = vor.u32 %v366_v15, %v285_v16  ;;  %v305_v19 = vld [vmem:[%s524_s0 + $0x20] sm:$0xf]  ;;  %v371_v20 = vld [vmem:[%s524_s0 + $0x24] sm:$0xf0]  ;;  %v370_v21 = vld [vmem:[%s524_s0 + $0x24] sm:$0xf] }
   0x6   :  { %123 = vmatpush.bf16.msra.mxu3 %v318_v13  ;;  %v306_v22 = vor.u32 %v371_v20, %v305_v19  ;;  %v307_v23 = vld [vmem:[%s524_s0 + $0x28] sm:$0xf0]  ;;  %v365_v24 = vld [vmem:[%s525_s1] sm:$0xff]  ;;  %v357_v25 = vld [vmem:[%s524_s0 + $0x70] sm:$0xf] }
   0x7   :  { %v310_v26 = vor.u32 %v370_v21, %v307_v23  ;;  %v381_v27 = vld [vmem:[%s524_s0 + $0x74] sm:$0xf0]  ;;  %v380_v28 = vld [vmem:[%s524_s0 + $0x74] sm:$0xf]  ;;  %v359_v29 = vld [vmem:[%s524_s0 + $0x78] sm:$0xf0] }
   0x8   :  { %57 = vmatpush.bf16.msra.mxu0 %v284_v17  ;;  %v358_v30 = vor.u32 %v381_v27, %v357_v25  ;;  %v362_v31 = vor.u32 %v380_v28, %v359_v29  ;;  %v335_v32 = vld [vmem:[%s524_s0 + $0x50] sm:$0xf]  ;;  %v377_v33 = vld [vmem:[%s524_s0 + $0x54] sm:$0xf0]  ;;  %v376_v34 = vld [vmem:[%s524_s0 + $0x54] sm:$0xf] }
   0x9   :  { %71 = vmatpush.bf16.msra.mxu1 %v288_v18  ;;  %110 = vmatpush.bf16.msra.mxu2 %v306_v22  ;;  %v336_v35 = vor.u32 %v377_v33, %v335_v32  ;;  %v337_v36 = vld [vmem:[%s524_s0 + $0x58] sm:$0xf0]  ;;  %v349_v37 = vld [vmem:[%s524_s0 + $0x60] sm:$0xf]  ;;  %v379_v38 = vld [vmem:[%s524_s0 + $0x64] sm:$0xf0] }
   0xa   :  { %124 = vmatpush.bf16.msra.mxu3 %v310_v26  ;;  %v340_v39 = vor.u32 %v376_v34, %v337_v36  ;;  %v350_v40 = vor.u32 %v379_v38, %v349_v37  ;;  %v378_v41 = vld [vmem:[%s524_s0 + $0x64] sm:$0xf]  ;;  %v351_v42 = vld [vmem:[%s524_s0 + $0x68] sm:$0xf0]  ;;  %v327_v43 = vld [vmem:[%s524_s0 + $0x40] sm:$0xf] }
   0xb   :  { %297 = vmatmul.msk.bf16.vlgmr.msra.gmra.mxu0 %vm46_vm0, %v365_v24  ;;  %v354_v44 = vor.u32 %v378_v41, %v351_v42  ;;  %v375_v45 = vld [vmem:[%s524_s0 + $0x44] sm:$0xf0]  ;;  %v374_v46 = vld [vmem:[%s524_s0 + $0x44] sm:$0xf]  ;;  %v329_v47 = vld [vmem:[%s524_s0 + $0x48] sm:$0xf0] }
   0xc   :  { %298 = vmatmul.msk.bf16.vlgmr.msra.gmra.mxu1 %vm46_vm0, %v365_v24  ;;  %319 = vmatmul.msk.bf16.vlgmr.msra.gmra.mxu2 %vm46_vm0, %v365_v24  ;;  %v249_v48 = vld [vmem:[%s526_s2] sm:$0xff]  ;;  %v328_v49 = vor.u32 %v375_v45, %v327_v43  ;;  %v332_v50 = vor.u32 %v374_v46, %v329_v47  ;;  %v250_v51 = vld [vmem:[%s526_s2 + $0x8] sm:$0xff] }
   0xd   :  { %223 = vmatpush.bf16.msrb.mxu2 %v358_v30  ;;  %320 = vmatmul.msk.bf16.vlgmr.msra.gmra.mxu3 %vm46_vm0, %v365_v24 }
   0xe   :  { %237 = vmatpush.bf16.msrb.mxu3 %v362_v31  ;;  %166 = vmatpush.bf16.msrb.mxu0 %v336_v35 }
   0xf   :  { %180 = vmatpush.bf16.msrb.mxu1 %v340_v39  ;;  %253 = vperm.xlu0 %383, %v249_v48  }
  0x11   :  { %224 = vmatpush.bf16.msrb.mxu2 %v350_v40 }
  0x12   :  { %238 = vmatpush.bf16.msrb.mxu3 %v354_v44  ;;  %167 = vmatpush.bf16.msrb.mxu0 %v328_v49 }
  0x13   :  { %181 = vmatpush.bf16.msrb.mxu1 %v332_v50 }
  0x17   :  { %258 = vperm.xlu0 %383, %v250_v51  }
  0x1b   :  { %341 = vmatmul.msk.bf16.vlgmr.msrb.gmra.mxu0 %vm46_vm0, %v365_v24 }
  0x1c   :  { %342 = vmatmul.msk.bf16.vlgmr.msrb.gmra.mxu1 %vm46_vm0, %v365_v24  ;;  %363 = vmatmul.msk.bf16.vlgmr.msrb.gmra.mxu2 %vm46_vm0, %v365_v24 }
  0x1d   :  { %364 = vmatmul.msk.bf16.vlgmr.msrb.gmra.mxu3 %vm46_vm0, %v365_v24 }
  0x81   :  { %v254_v1 = vpop.permute.xlu0 %253 }
  0x88   :  { %v59_v52 = vpop.f32.mrf.mxu0 }
  0x89   :  { %v73_v53 = vpop.f32.mrf.mxu1  ;;  %v259_v21 = vpop.permute.xlu0 %258 }
  0x8f   :  { %v112_v54 = vpop.f32.mrf.mxu2 }
  0x90   :  { %v126_v55 = vpop.f32.mrf.mxu3  ;;  %v61_v56 = vpop.f32.mrf.mxu0  ;;  %v131_v62 = vmax.f32 %v59_v52, %v112_v54 }
  0x91   :  { %v75_v57 = vpop.f32.mrf.mxu1  ;;  %v132_v63 = vmax.f32 %v73_v53, %v126_v55 }
  0x97   :  { %v114_v58 = vpop.f32.mrf.mxu2 }
  0x98   :  { %v128_v59 = vpop.f32.mrf.mxu3  ;;  %v169_v60 = vpop.f32.mrf.mxu0  ;;  %v133_v10 = vmax.f32 %v61_v56, %v114_v58 }
  0x99   :  { %v183_v61 = vpop.f32.mrf.mxu1  ;;  %v188_v0 = vmax.f32 %v131_v62, %v169_v60  ;;  %v134_v13 = vmax.f32 %v75_v57, %v128_v59 }
  0x9a   :  { %v189_v2 = vmax.f32 %v132_v63, %v183_v61 }
  0x9f   :  { %v226_v3 = vpop.f32.mrf.mxu2 }
  0xa0   :  { %v245_v4 = vmax.f32 %v188_v0, %v226_v3  ;;  %v240_v5 = vpop.f32.mrf.mxu3  ;;  %v171_v9 = vpop.f32.mrf.mxu0 }
  0xa1   :  { %v246_v6 = vmax.f32 %v189_v2, %v240_v5  ;;  %v185_v12 = vpop.f32.mrf.mxu1  ;;  %v190_v15 = vmax.f32 %v133_v10, %v171_v9 }
  0xa2   :  { %v261_v7 = vadd.f32 %v254_v1, %v245_v4  ;;  %v191_v17 = vmax.f32 %v134_v13, %v185_v12 }
  0xa3   :  { %v262_v8 = vadd.f32 %v254_v1, %v246_v6 }
  0xa4   :  { %v265_v11 = vmax.f32 %v261_v7, 0.0 }
  0xa5   :  { %v266_v14 = vmax.f32 %v262_v8, 0.0 }
  0xa7   :  { %v269_v16 = vpack.c.bf16 %v266_v14, %v265_v11  ;;  %v228_v18 = vpop.f32.mrf.mxu2 }
  0xa8   :  { %v247_v19 = vmax.f32 %v190_v15, %v228_v18  ;;  %v242_v20 = vpop.f32.mrf.mxu3 }
  0xa9   :  { %271 = vst [vmem:[%s527_s3] sm:$0xff] %v269_v16  ;;  %v248_v22 = vmax.f32 %v191_v17, %v242_v20 }
  0xaa   :  { %v263_v23 = vadd.f32 %v259_v21, %v247_v19 }
  0xab   :  { %v264_v24 = vadd.f32 %v259_v21, %v248_v22 }
  0xac   :  { %v267_v25 = vmax.f32 %v263_v23, 0.0 }
  0xad   :  { %v268_v26 = vmax.f32 %v264_v24, 0.0 }
  0xaf   :  { %v270_v27 = vpack.c.bf16 %v268_v26, %v267_v25 }
  0xb1   :  { %272 = vst [vmem:[%s527_s3 + $0x8] sm:$0xff] %v270_v27 }

// kernel: encoder_mlp_forward.7
= control target key start
LH: loop header
LB: loop body
LE: loop exit
PB: predicated region body
PF: predicated region fallthrough
CT: control target
= control target key end

     0   :  { %v435_v8 = vmov 0   ;;  %vm61_vm0 = vcmask 523264   ;;  %s528_s0 = inlined_call_operand.vmem [shape: bf16[4,64,128], index: 0, kind: input, shape index: {}]   ;;  %s529_s2 = inlined_call_operand.vmem [shape: f32[32,1], index: 2, kind: input, shape index: {}]   ;;  %s530_s1 = inlined_call_operand.vmem [shape: bf16[32,64], index: 1, kind: input, shape index: {}]   ;;  %s531_s3 = inlined_call_operand.vmem [shape: bf16[32,128], index: 3, kind: output, shape index: {}]  }
   0x1   :  { %v408_v0 = vld [vmem:[%s528_s0 + $0x18] sm:$0xff]  ;;  %v407_v4 = vld [vmem:[%s528_s0 + $0x10] sm:$0xff]  ;;  %433 = vset.pattern.permute.xlu0 %v435_v8  ;;  %434 = vset.pattern.permute.xlu1 %v435_v8  ;;  %v406_v9 = vld [vmem:[%s528_s0 + $0x8] sm:$0xff] }
   0x2   :  { %v412_v1 = vld [vmem:[%s528_s0 + $0x38] sm:$0xff]  ;;  %72 = vmatpush.bf16.msra.mxu0 %v408_v0  ;;  %v411_v5 = vld [vmem:[%s528_s0 + $0x30] sm:$0xff]  ;;  %v410_v10 = vld [vmem:[%s528_s0 + $0x28] sm:$0xff] }
   0x3   :  { %v416_v2 = vld [vmem:[%s528_s0 + $0x58] sm:$0xff]  ;;  %124 = vmatpush.bf16.msra.mxu1 %v412_v1  ;;  %v415_v6 = vld [vmem:[%s528_s0 + $0x50] sm:$0xff]  ;;  %v255_v11 = vld [vmem:[%s529_s2] sm:$0xff] }
   0x4   :  { %v420_v3 = vld [vmem:[%s528_s0 + $0x78] sm:$0xff]  ;;  %180 = vmatpush.bf16.msra.mxu2 %v416_v2  ;;  %v419_v7 = vld [vmem:[%s528_s0 + $0x70] sm:$0xff]  ;;  %v414_v13 = vld [vmem:[%s528_s0 + $0x48] sm:$0xff]  ;;  %261 = vperm.xlu0 %433, %v255_v11  }
   0x5   :  { %236 = vmatpush.bf16.msra.mxu3 %v420_v3  ;;  %v257_v12 = vld [vmem:[%s529_s2 + $0x10] sm:$0xff]  ;;  %v418_v14 = vld [vmem:[%s528_s0 + $0x68] sm:$0xff]  ;;  %v405_v15 = vld [vmem:[%s528_s0] sm:$0xff] }
   0x6   :  { %73 = vmatpush.bf16.msra.mxu0 %v407_v4  ;;  %271 = vperm.xlu1 %434, %v257_v12   ;;  %v409_v16 = vld [vmem:[%s528_s0 + $0x20] sm:$0xff]  ;;  %v256_v20 = vld [vmem:[%s529_s2 + $0x8] sm:$0xff]  ;;  %v258_v21 = vld [vmem:[%s529_s2 + $0x18] sm:$0xff] }
   0x7   :  { %125 = vmatpush.bf16.msra.mxu1 %v411_v5  ;;  %v413_v17 = vld [vmem:[%s528_s0 + $0x40] sm:$0xff]  ;;  %v404_v22 = vld [vmem:[%s530_s1 + $0x8] sm:$0xff] }
   0x8   :  { %181 = vmatpush.bf16.msra.mxu2 %v415_v6  ;;  %v417_v18 = vld [vmem:[%s528_s0 + $0x60] sm:$0xff] }
   0x9   :  { %237 = vmatpush.bf16.msra.mxu3 %v419_v7  ;;  %v403_v19 = vld [vmem:[%s530_s1] sm:$0xff] }
   0xa   :  { %74 = vmatpush.bf16.msra.mxu0 %v406_v9 }
   0xb   :  { %126 = vmatpush.bf16.msra.mxu1 %v410_v10 }
   0xc   :  { %182 = vmatpush.bf16.msra.mxu2 %v414_v13  ;;  %266 = vperm.xlu0 %433, %v256_v20  }
   0xd   :  { %238 = vmatpush.bf16.msra.mxu3 %v418_v14 }
   0xe   :  { %75 = vmatpush.bf16.msra.mxu0 %v405_v15  ;;  %276 = vperm.xlu1 %434, %v258_v21  }
   0xf   :  { %127 = vmatpush.bf16.msra.mxu1 %v409_v16 }
  0x10   :  { %183 = vmatpush.bf16.msra.mxu2 %v413_v17 }
  0x11   :  { %239 = vmatpush.bf16.msra.mxu3 %v417_v18  ;;  %323 = vmatmul.msk.bf16.vlgmr.msra.gmra.mxu0 %vm61_vm0, %v403_v19 }
  0x12   :  { %349 = vmatmul.msk.bf16.vlgmr.msra.gmra.mxu1 %vm61_vm0, %v403_v19 }
  0x13   :  { %375 = vmatmul.msk.bf16.vlgmr.msra.gmra.mxu2 %vm61_vm0, %v403_v19 }
  0x14   :  { %401 = vmatmul.msk.bf16.vlgmr.msra.gmra.mxu3 %vm61_vm0, %v403_v19 }
  0x21   :  { %324 = vmatmul.msk.bf16.gmra.mxu0 %vm61_vm0, %v404_v22 }
  0x22   :  { %350 = vmatmul.msk.bf16.gmra.mxu1 %vm61_vm0, %v404_v22 }
  0x23   :  { %376 = vmatmul.msk.bf16.gmra.mxu2 %vm61_vm0, %v404_v22 }
  0x24   :  { %402 = vmatmul.msk.bf16.gmra.mxu3 %vm61_vm0, %v404_v22 }
  0x76   :  { %v262_v26 = vpop.permute.xlu0 %261 }
  0x78   :  { %v272_v49 = vpop.permute.xlu1 %271 }
  0x7e   :  { %v267_v37 = vpop.permute.xlu0 %266 }
  0x80   :  { %v277_v60 = vpop.permute.xlu1 %276 }
  0x8e   :  { %v77_v23 = vpop.f32.mrf.mxu0 }
  0x8f   :  { %v129_v24 = vpop.f32.mrf.mxu1 }
  0x90   :  { %v139_v25 = vmax.f32 %v77_v23, %v129_v24 }
  0x96   :  { %v185_v27 = vpop.f32.mrf.mxu2  ;;  %v79_v29 = vpop.f32.mrf.mxu0 }
  0x97   :  { %v241_v28 = vpop.f32.mrf.mxu3  ;;  %v131_v30 = vpop.f32.mrf.mxu1  ;;  %v195_v31 = vmax.f32 %v139_v25, %v185_v27 }
  0x98   :  { %v140_v33 = vmax.f32 %v79_v29, %v131_v30 }
  0x99   :  { %v251_v32 = vmax.f32 %v195_v31, %v241_v28 }
  0x9b   :  { %v279_v40 = vadd.f32 %v262_v26, %v251_v32 }
  0x9d   :  { %v283_v43 = vmax.f32 %v279_v40, 0.0 }
  0x9e   :  { %v187_v34 = vpop.f32.mrf.mxu2  ;;  %v82_v38 = vpop.f32.mrf.mxu0 }
  0x9f   :  { %v243_v35 = vpop.f32.mrf.mxu3  ;;  %v196_v36 = vmax.f32 %v140_v33, %v187_v34  ;;  %v134_v39 = vpop.f32.mrf.mxu1 }
  0xa0   :  { %v141_v44 = vmax.f32 %v82_v38, %v134_v39 }
  0xa1   :  { %v252_v41 = vmax.f32 %v196_v36, %v243_v35 }
  0xa3   :  { %v280_v42 = vadd.f32 %v267_v37, %v252_v41 }
  0xa5   :  { %v284_v45 = vmax.f32 %v280_v42, 0.0 }
  0xa6   :  { %v190_v46 = vpop.f32.mrf.mxu2  ;;  %v84_v51 = vpop.f32.mrf.mxu0 }
  0xa7   :  { %v246_v47 = vpop.f32.mrf.mxu3  ;;  %v424_v48 = vpack.c.bf16 %v284_v45, %v283_v43  ;;  %v197_v50 = vmax.f32 %v141_v44, %v190_v46  ;;  %v136_v52 = vpop.f32.mrf.mxu1 }
  0xa8   :  { %v142_v54 = vmax.f32 %v84_v51, %v136_v52 }
  0xa9   :  { %425 = vst [vmem:[%s531_s3] sm:$0xff] %v424_v48   ;;  %v253_v53 = vmax.f32 %v197_v50, %v246_v47 }
  0xab   :  { %v281_v58 = vadd.f32 %v272_v49, %v253_v53 }
  0xad   :  { %v285_v62 = vmax.f32 %v281_v58, 0.0 }
  0xae   :  { %v192_v55 = vpop.f32.mrf.mxu2 }
  0xaf   :  { %v198_v56 = vmax.f32 %v142_v54, %v192_v55  ;;  %v248_v57 = vpop.f32.mrf.mxu3 }
  0xb1   :  { %v254_v59 = vmax.f32 %v198_v56, %v248_v57 }
  0xb3   :  { %v282_v61 = vadd.f32 %v277_v60, %v254_v59 }
  0xb5   :  { %v286_v63 = vmax.f32 %v282_v61, 0.0 }
  0xb7   :  { %v429_v0 = vpack.c.bf16 %v286_v63, %v285_v62 }
  0xb9   :  { %431 = vst [vmem:[%s531_s3 + $0x8] sm:$0xff] %v429_v0  }

// kernel: encoder_mlp_forward.8
= control target key start
LH: loop header
LB: loop body
LE: loop exit
PB: predicated region body
PF: predicated region fallthrough
CT: control target
= control target key end

     0   :  { %s1225_s12 = smov 0   ;;  %s1227_s13 = smov 0   ;;  %s1463_s0 = inlined_call_operand.vmem [shape: bf16[4,512], index: 0, kind: input, shape index: {}]   ;;  %s1464_s1 = inlined_call_operand.vmem [shape: bf16[512,256], index: 1, kind: input, shape index: {}]   ;;  %s1465_s2 = inlined_call_operand.vmem [shape: f32[1,256], index: 2, kind: input, shape index: {}]   ;;  %s1466_s3 = inlined_call_operand.vmem [shape: f32[4,256], index: 3, kind: output, shape index: {}]  }
   0x1   :  { %s1229_s14 = smov 0   ;;  %s1231_s15 = smov 0  }
   0x2   :  { %s1233_s16 = smov 0  }
   0x3 LB: > { %s25_s17 = sadd.s32 1, %s1198_s15  ;;  %p67_p1 = scmp.ne.s32.totalorder %s1190_s13, %s1186_s12  ;;  %s1202_s16 = sphi %s1233_s16, %s13_s16   ;;  %s1198_s15 = sphi %s1231_s15, %s1470_s15   ;;  %s1194_s14 = sphi %s1229_s14, %s1469_s14   ;;  %s1190_s13 = sphi %s1227_s13, %s1468_s13   ;;  %s1186_s12 = sphi %s1225_s12, %s1467_s12  }
   0x4   : > { %p27_p0 = scmp.ge.s32.totalorder %s25_s17, 2  ;;  %p68_p2 = scmp.eq.s32.totalorder %s1202_s16, 0 }
   0x5   : > { %s60_s19 = sadd.s32 1, %s1190_s13  ;;  %p954_p5 = scmp.ge.s32.totalorder %s1202_s16, 2 }
   0x6   : > { %s1472_s17 = smov (%p27_p0, %s25_s17), 0  ;;  %p69_p3 = por %p68_p2, %p67_p1 }
   0x7   : > { %s56_s18 = ssub.s32 %s1198_s15, %s1472_s17  ;;  %154 = sbr.rel (%p954_p5) target bundleno = 80 (0x50), region = 20 }
   0x8   : > { %p58_p4 = scmp.eq.s32.totalorder %s56_s18, 0 }
   0xa   : > { %s1260_s20 = scalar_select %p58_p4, %s1190_s13, %s60_s19  }
   0xc   : > { %157 = sbr.rel (!%p69_p3) target bundleno = 80 (0x50), region = 24  ;;  %s159_s21 = sand.u32 (%p69_p3), 1, %s1190_s13  }
   0xd   : > { %s956_s22 = sshll.u32 (%p69_p3), %s1198_s15, 2  ;;  %s955_s23 = sshll.u32 (%p69_p3), %s159_s21, 8 }
   0xe   : > { %s1268_s26 = scalar_lea.vmem (%p69_p3), %s1464_s1, %s956_s22  ;;  %s1272_s27 = scalar_lea.vmem (%p69_p3), [#allocation3], %s955_s23 }
   0xf   : > { %v183_v0 = vld [vmem:[%s1268_s26] sm:$0xf] (%p69_p3)  ;;  %v185_v1 = vld [vmem:[%s1268_s26 + $0x8] sm:$0xf] (%p69_p3)  ;;  %v187_v2 = vld [vmem:[%s1268_s26 + $0x10] sm:$0xf] (%p69_p3) }
  0x10   : > { %184 = vst [vmem:[%s1272_s27] sm:$0xf] (%p69_p3), %v183_v0  ;;  %v189_v3 = vld [vmem:[%s1268_s26 + $0x18] sm:$0xf] (%p69_p3)  ;;  %v191_v4 = vld [vmem:[%s1268_s26 + $0x20] sm:$0xf] (%p69_p3) }
  0x11   : > { %186 = vst [vmem:[%s1272_s27 + $0x4] sm:$0xf] %v185_v1  ;;  %v193_v5 = vld [vmem:[%s1268_s26 + $0x28] sm:$0xf]  ;;  %v195_v6 = vld [vmem:[%s1268_s26 + $0x30] sm:$0xf] }
  0x12   : > { %188 = vst [vmem:[%s1272_s27 + $0x8] sm:$0xf] %v187_v2  ;;  %v197_v7 = vld [vmem:[%s1268_s26 + $0x38] sm:$0xf]  ;;  %v199_v8 = vld [vmem:[%s1268_s26 + $0x40] sm:$0xf] }
  0x13   : > { %190 = vst [vmem:[%s1272_s27 + $0xc] sm:$0xf] %v189_v3  ;;  %v201_v9 = vld [vmem:[%s1268_s26 + $0x48] sm:$0xf]  ;;  %v203_v10 = vld [vmem:[%s1268_s26 + $0x50] sm:$0xf] }
  0x14   : > { %192 = vst [vmem:[%s1272_s27 + $0x10] sm:$0xf] %v191_v4  ;;  %v205_v11 = vld [vmem:[%s1268_s26 + $0x58] sm:$0xf]  ;;  %v207_v12 = vld [vmem:[%s1268_s26 + $0x60] sm:$0xf] }
  0x15   : > { %194 = vst [vmem:[%s1272_s27 + $0x14] sm:$0xf] %v193_v5  ;;  %v209_v13 = vld [vmem:[%s1268_s26 + $0x68] sm:$0xf]  ;;  %v211_v14 = vld [vmem:[%s1268_s26 + $0x70] sm:$0xf] }
  0x16   : > { %196 = vst [vmem:[%s1272_s27 + $0x18] sm:$0xf] %v195_v6  ;;  %v213_v15 = vld [vmem:[%s1268_s26 + $0x78] sm:$0xf]  ;;  %v215_v16 = vld [vmem:[%s1268_s26 + $0x80] sm:$0xf] }
  0x17   : > { %198 = vst [vmem:[%s1272_s27 + $0x1c] sm:$0xf] %v197_v7  ;;  %v217_v17 = vld [vmem:[%s1268_s26 + $0x88] sm:$0xf]  ;;  %v219_v18 = vld [vmem:[%s1268_s26 + $0x90] sm:$0xf] }
  0x18   : > { %200 = vst [vmem:[%s1272_s27 + $0x20] sm:$0xf] %v199_v8  ;;  %v221_v19 = vld [vmem:[%s1268_s26 + $0x98] sm:$0xf]  ;;  %v223_v20 = vld [vmem:[%s1268_s26 + $0xa0] sm:$0xf] }
  0x19   : > { %202 = vst [vmem:[%s1272_s27 + $0x24] sm:$0xf] %v201_v9  ;;  %v225_v21 = vld [vmem:[%s1268_s26 + $0xa8] sm:$0xf]  ;;  %v227_v22 = vld [vmem:[%s1268_s26 + $0xb0] sm:$0xf] }
  0x1a   : > { %204 = vst [vmem:[%s1272_s27 + $0x28] sm:$0xf] %v203_v10  ;;  %v229_v23 = vld [vmem:[%s1268_s26 + $0xb8] sm:$0xf]  ;;  %v231_v24 = vld [vmem:[%s1268_s26 + $0xc0] sm:$0xf] }
  0x1b   : > { %206 = vst [vmem:[%s1272_s27 + $0x2c] sm:$0xf] %v205_v11  ;;  %v233_v25 = vld [vmem:[%s1268_s26 + $0xc8] sm:$0xf]  ;;  %v235_v26 = vld [vmem:[%s1268_s26 + $0xd0] sm:$0xf] }
  0x1c   : > { %208 = vst [vmem:[%s1272_s27 + $0x30] sm:$0xf] %v207_v12  ;;  %v237_v27 = vld [vmem:[%s1268_s26 + $0xd8] sm:$0xf]  ;;  %v239_v28 = vld [vmem:[%s1268_s26 + $0xe0] sm:$0xf] }
  0x1d   : > { %210 = vst [vmem:[%s1272_s27 + $0x34] sm:$0xf] %v209_v13  ;;  %v241_v29 = vld [vmem:[%s1268_s26 + $0xe8] sm:$0xf]  ;;  %v243_v30 = vld [vmem:[%s1268_s26 + $0xf0] sm:$0xf] }
  0x1e   : > { %212 = vst [vmem:[%s1272_s27 + $0x38] sm:$0xf] %v211_v14  ;;  %v245_v31 = vld [vmem:[%s1268_s26 + $0xf8] sm:$0xf]  ;;  %v247_v32 = vld [vmem:[%s1268_s26 + $0x100] sm:$0xf] }
  0x1f   : > { %214 = vst [vmem:[%s1272_s27 + $0x3c] sm:$0xf] %v213_v15  ;;  %v249_v33 = vld [vmem:[%s1268_s26 + $0x108] sm:$0xf]  ;;  %v251_v34 = vld [vmem:[%s1268_s26 + $0x110] sm:$0xf] }
  0x20   : > { %216 = vst [vmem:[%s1272_s27 + $0x40] sm:$0xf] %v215_v16  ;;  %v253_v35 = vld [vmem:[%s1268_s26 + $0x118] sm:$0xf]  ;;  %v255_v36 = vld [vmem:[%s1268_s26 + $0x120] sm:$0xf] }
  0x21   : > { %218 = vst [vmem:[%s1272_s27 + $0x44] sm:$0xf] %v217_v17  ;;  %v257_v37 = vld [vmem:[%s1268_s26 + $0x128] sm:$0xf]  ;;  %v259_v38 = vld [vmem:[%s1268_s26 + $0x130] sm:$0xf] }
  0x22   : > { %220 = vst [vmem:[%s1272_s27 + $0x48] sm:$0xf] %v219_v18  ;;  %v261_v39 = vld [vmem:[%s1268_s26 + $0x138] sm:$0xf]  ;;  %v263_v40 = vld [vmem:[%s1268_s26 + $0x140] sm:$0xf] }
  0x23   : > { %222 = vst [vmem:[%s1272_s27 + $0x4c] sm:$0xf] %v221_v19  ;;  %v265_v41 = vld [vmem:[%s1268_s26 + $0x148] sm:$0xf]  ;;  %v267_v42 = vld [vmem:[%s1268_s26 + $0x150] sm:$0xf] }
  0x24   : > { %224 = vst [vmem:[%s1272_s27 + $0x50] sm:$0xf] %v223_v20  ;;  %v269_v43 = vld [vmem:[%s1268_s26 + $0x158] sm:$0xf]  ;;  %v271_v44 = vld [vmem:[%s1268_s26 + $0x160] sm:$0xf] }
  0x25   : > { %226 = vst [vmem:[%s1272_s27 + $0x54] sm:$0xf] %v225_v21  ;;  %v273_v45 = vld [vmem:[%s1268_s26 + $0x168] sm:$0xf]  ;;  %v275_v46 = vld [vmem:[%s1268_s26 + $0x170] sm:$0xf] }
  0x26   : > { %228 = vst [vmem:[%s1272_s27 + $0x58] sm:$0xf] %v227_v22  ;;  %v277_v47 = vld [vmem:[%s1268_s26 + $0x178] sm:$0xf]  ;;  %v279_v48 = vld [vmem:[%s1268_s26 + $0x180] sm:$0xf] }
  0x27   : > { %230 = vst [vmem:[%s1272_s27 + $0x5c] sm:$0xf] %v229_v23  ;;  %v281_v49 = vld [vmem:[%s1268_s26 + $0x188] sm:$0xf]  ;;  %v283_v50 = vld [vmem:[%s1268_s26 + $0x190] sm:$0xf] }
  0x28   : > { %232 = vst [vmem:[%s1272_s27 + $0x60] sm:$0xf] %v231_v24  ;;  %v285_v51 = vld [vmem:[%s1268_s26 + $0x198] sm:$0xf]  ;;  %v287_v52 = vld [vmem:[%s1268_s26 + $0x1a0] sm:$0xf] }
  0x29   : > { %234 = vst [vmem:[%s1272_s27 + $0x64] sm:$0xf] %v233_v25  ;;  %v289_v53 = vld [vmem:[%s1268_s26 + $0x1a8] sm:$0xf]  ;;  %v291_v54 = vld [vmem:[%s1268_s26 + $0x1b0] sm:$0xf] }
  0x2a   : > { %236 = vst [vmem:[%s1272_s27 + $0x68] sm:$0xf] %v235_v26  ;;  %v293_v55 = vld [vmem:[%s1268_s26 + $0x1b8] sm:$0xf]  ;;  %v295_v56 = vld [vmem:[%s1268_s26 + $0x1c0] sm:$0xf] }
  0x2b   : > { %238 = vst [vmem:[%s1272_s27 + $0x6c] sm:$0xf] %v237_v27  ;;  %v297_v57 = vld [vmem:[%s1268_s26 + $0x1c8] sm:$0xf]  ;;  %v299_v58 = vld [vmem:[%s1268_s26 + $0x1d0] sm:$0xf] }
  0x2c   : > { %240 = vst [vmem:[%s1272_s27 + $0x70] sm:$0xf] %v239_v28  ;;  %v301_v59 = vld [vmem:[%s1268_s26 + $0x1d8] sm:$0xf]  ;;  %v303_v60 = vld [vmem:[%s1268_s26 + $0x1e0] sm:$0xf] }
  0x2d   : > { %242 = vst [vmem:[%s1272_s27 + $0x74] sm:$0xf] %v241_v29  ;;  %v305_v61 = vld [vmem:[%s1268_s26 + $0x1e8] sm:$0xf]  ;;  %v307_v62 = vld [vmem:[%s1268_s26 + $0x1f0] sm:$0xf] }
  0x2e   : > { %244 = vst [vmem:[%s1272_s27 + $0x78] sm:$0xf] %v243_v30  ;;  %v309_v63 = vld [vmem:[%s1268_s26 + $0x1f8] sm:$0xf] }
  0x2f   : > { %246 = vst [vmem:[%s1272_s27 + $0x7c] sm:$0xf] %v245_v31 }
  0x30   : > { %248 = vst [vmem:[%s1272_s27 + $0x80] sm:$0xf] %v247_v32 }
  0x31   : > { %250 = vst [vmem:[%s1272_s27 + $0x84] sm:$0xf] %v249_v33 }
  0x32   : > { %252 = vst [vmem:[%s1272_s27 + $0x88] sm:$0xf] %v251_v34 }
  0x33   : > { %254 = vst [vmem:[%s1272_s27 + $0x8c] sm:$0xf] %v253_v35 }
  0x34   : > { %256 = vst [vmem:[%s1272_s27 + $0x90] sm:$0xf] %v255_v36 }
  0x35   : > { %258 = vst [vmem:[%s1272_s27 + $0x94] sm:$0xf] %v257_v37 }
  0x36   : > { %260 = vst [vmem:[%s1272_s27 + $0x98] sm:$0xf] %v259_v38 }
  0x37   : > { %262 = vst [vmem:[%s1272_s27 + $0x9c] sm:$0xf] %v261_v39 }
  0x38   : > { %264 = vst [vmem:[%s1272_s27 + $0xa0] sm:$0xf] %v263_v40 }
  0x39   : > { %266 = vst [vmem:[%s1272_s27 + $0xa4] sm:$0xf] %v265_v41 }
  0x3a   : > { %268 = vst [vmem:[%s1272_s27 + $0xa8] sm:$0xf] %v267_v42 }
  0x3b   : > { %270 = vst [vmem:[%s1272_s27 + $0xac] sm:$0xf] %v269_v43 }
  0x3c   : > { %272 = vst [vmem:[%s1272_s27 + $0xb0] sm:$0xf] %v271_v44 }
  0x3d   : > { %274 = vst [vmem:[%s1272_s27 + $0xb4] sm:$0xf] %v273_v45 }
  0x3e   : > { %276 = vst [vmem:[%s1272_s27 + $0xb8] sm:$0xf] %v275_v46 }
  0x3f   : > { %278 = vst [vmem:[%s1272_s27 + $0xbc] sm:$0xf] %v277_v47 }
  0x40   : > { %280 = vst [vmem:[%s1272_s27 + $0xc0] sm:$0xf] %v279_v48 }
  0x41   : > { %282 = vst [vmem:[%s1272_s27 + $0xc4] sm:$0xf] %v281_v49 }
  0x42   : > { %284 = vst [vmem:[%s1272_s27 + $0xc8] sm:$0xf] %v283_v50 }
  0x43   : > { %286 = vst [vmem:[%s1272_s27 + $0xcc] sm:$0xf] %v285_v51 }
  0x44   : > { %288 = vst [vmem:[%s1272_s27 + $0xd0] sm:$0xf] %v287_v52 }
  0x45   : > { %290 = vst [vmem:[%s1272_s27 + $0xd4] sm:$0xf] %v289_v53 }
  0x46   : > { %292 = vst [vmem:[%s1272_s27 + $0xd8] sm:$0xf] %v291_v54 }
  0x47   : > { %294 = vst [vmem:[%s1272_s27 + $0xdc] sm:$0xf] %v293_v55 }
  0x48   : > { %296 = vst [vmem:[%s1272_s27 + $0xe0] sm:$0xf] %v295_v56 }
  0x49   : > { %298 = vst [vmem:[%s1272_s27 + $0xe4] sm:$0xf] %v297_v57 }
  0x4a   : > { %300 = vst [vmem:[%s1272_s27 + $0xe8] sm:$0xf] %v299_v58 }
  0x4b   : > { %302 = vst [vmem:[%s1272_s27 + $0xec] sm:$0xf] %v301_v59 }
  0x4c   : > { %304 = vst [vmem:[%s1272_s27 + $0xf0] sm:$0xf] %v303_v60 }
  0x4d   : > { %306 = vst [vmem:[%s1272_s27 + $0xf4] sm:$0xf] %v305_v61 }
  0x4e   : > { %308 = vst [vmem:[%s1272_s27 + $0xf8] sm:$0xf] %v307_v62 }
  0x4f   : > { %310 = vst [vmem:[%s1272_s27 + $0xfc] sm:$0xf] %v309_v63 }
  0x50 PF: > { %p957_p6 = scmp.ge.s32.totalorder %s1202_s16, 1  ;;  %p467_p7 = scmp.lt.s32.totalorder %s1202_s16, 3 }
  0x52   : > { %p468_p8 = pnand %p957_p6, %p467_p7 }
  0x53   : > { %s474_s28 = sand.u32 (!%p468_p8), 1, %s1186_s12   ;;  %p511_p9 = scmp.lt.s32.totalorder (!%p468_p8), %s1194_s14, 1 }
  0x54   : > { %471 = sbr.rel (%p468_p8) target bundleno = 275 (0x113), region = 69  ;;  %s958_s4 = sshll.u32 (!%p468_p8), %s474_s28, 8 }
  0x55   : > { %s1406_s5 = scalar_lea.vmem (!%p468_p8), [#allocation3], %s958_s4 }
  0x59   : > { %v524_v0 = vld [vmem:[%s1463_s0] sm:$0xff]  ;;  %v1095_v9 = vld [vmem:[%s1406_s5 + $0x28] sm:$0xff]  ;;  %v1094_v13 = vld [vmem:[%s1406_s5 + $0x20] sm:$0xff]  ;;  %s1474_s14 = smov (!%p511_p9, %s1194_s14), 1  ;;  %v1204_v37 = vmov 0.0  }
  0x5a   : > { %590 = vst [vmem:[#allocation1] ss:$4 sm:$0xff] %v524_v0  ;;  %v1097_v1 = vld [vmem:[%s1406_s5 + $0x38] sm:$0xff]  ;;  %v1096_v5 = vld [vmem:[%s1406_s5 + $0x30] sm:$0xff]  ;;  %v1103_v10 = vld [vmem:[%s1406_s5 + $0x68] sm:$0xff]  ;;  %s513_s8 = scalar_lea.vmem %s1465_s2, %s1474_s14  ;;  %s959_s9 = sshll.u32 %s1474_s14, 2 }
  0x5b   : > { %v1105_v2 = vld [vmem:[%s1406_s5 + $0x78] sm:$0xff]  ;;  %791 = vmatpush.bf16.msra.mxu0 %v1097_v1  ;;  %v1104_v6 = vld [vmem:[%s1406_s5 + $0x70] sm:$0xff]  ;;  %v1111_v11 = vld [vmem:[%s1406_s5 + $0xa8] sm:$0xff]  ;;  %522 = vst [vmem:[#allocation2] sm:$0xf] %v1204_v37  ;;  %s517_s12 = scalar_lea.vmem %s1466_s3, %s959_s9 }
  0x5c   : > { %v1113_v3 = vld [vmem:[%s1406_s5 + $0xb8] sm:$0xff]  ;;  %804 = vmatpush.bf16.msra.mxu1 %v1105_v2  ;;  %v1112_v7 = vld [vmem:[%s1406_s5 + $0xb0] sm:$0xff]  ;;  %v1119_v12 = vld [vmem:[%s1406_s5 + $0xe8] sm:$0xff] }
  0x5d   : > { %v1121_v4 = vld [vmem:[%s1406_s5 + $0xf8] sm:$0xff]  ;;  %817 = vmatpush.bf16.msra.mxu2 %v1113_v3  ;;  %v1120_v8 = vld [vmem:[%s1406_s5 + $0xf0] sm:$0xff]  ;;  %v1102_v14 = vld [vmem:[%s1406_s5 + $0x60] sm:$0xff] }
  0x5e   : > { %830 = vmatpush.bf16.msra.mxu3 %v1121_v4  ;;  %v1110_v15 = vld [vmem:[%s1406_s5 + $0xa0] sm:$0xff]  ;;  %v1093_v17 = vld [vmem:[%s1406_s5 + $0x18] sm:$0xff]  ;;  %v1092_v21 = vld [vmem:[%s1406_s5 + $0x10] sm:$0xff] }
  0x5f   : > { %792 = vmatpush.bf16.msra.mxu0 %v1096_v5  ;;  %v1118_v16 = vld [vmem:[%s1406_s5 + $0xe0] sm:$0xff]  ;;  %v1101_v18 = vld [vmem:[%s1406_s5 + $0x58] sm:$0xff]  ;;  %v1100_v22 = vld [vmem:[%s1406_s5 + $0x50] sm:$0xff] }
  0x60   : > { %805 = vmatpush.bf16.msra.mxu1 %v1104_v6  ;;  %v1109_v19 = vld [vmem:[%s1406_s5 + $0x98] sm:$0xff]  ;;  %v1108_v23 = vld [vmem:[%s1406_s5 + $0x90] sm:$0xff]  ;;  %v1091_v25 = vld [vmem:[%s1406_s5 + $0x8] sm:$0xff] }
  0x61   : > { %818 = vmatpush.bf16.msra.mxu2 %v1112_v7  ;;  %v1117_v20 = vld [vmem:[%s1406_s5 + $0xd8] sm:$0xff]  ;;  %v1116_v24 = vld [vmem:[%s1406_s5 + $0xd0] sm:$0xff]  ;;  %v1099_v26 = vld [vmem:[%s1406_s5 + $0x48] sm:$0xff] }
  0x62   : > { %831 = vmatpush.bf16.msra.mxu3 %v1120_v8  ;;  %v1107_v27 = vld [vmem:[%s1406_s5 + $0x88] sm:$0xff]  ;;  %v1090_v29 = vld [vmem:[%s1406_s5] sm:$0xff]  ;;  %v591_v33 = vld.sshfl [vmem:[#allocation1] sm:$0xff pattern:$0x73625140] }
  0x63   : > { %793 = vmatpush.bf16.msra.mxu0 %v1095_v9  ;;  %v1115_v28 = vld [vmem:[%s1406_s5 + $0xc8] sm:$0xff]  ;;  %v1098_v30 = vld [vmem:[%s1406_s5 + $0x40] sm:$0xff]  ;;  %v523_v46 = vld [vmem:[#allocation2] sm:$0xf] }
  0x64   : > { %806 = vmatpush.bf16.msra.mxu1 %v1103_v10  ;;  %v1106_v31 = vld [vmem:[%s1406_s5 + $0x80] sm:$0xff]  ;;  %v594_v36 = vld.sshfl [vmem:[#allocation1 + $0x18] sm:$0xff pattern:$0x73625140]  ;;  %v1163_v51 = vld [vmem:[%s513_s8] ss:$0 sm:$0xff] }
  0x65   : > { %819 = vmatpush.bf16.msra.mxu2 %v1111_v11  ;;  %v1114_v32 = vld [vmem:[%s1406_s5 + $0xc0] sm:$0xff] }
  0x66   : > { %832 = vmatpush.bf16.msra.mxu3 %v1119_v12  ;;  %v592_v34 = vld.sshfl [vmem:[#allocation1 + $0x8] sm:$0xff pattern:$0x73625140]  ;;  %v593_v35 = vld.sshfl [vmem:[#allocation1 + $0x10] sm:$0xff pattern:$0x73625140] }
  0x67   : > { %794 = vmatpush.bf16.msra.mxu0 %v1094_v13 }
  0x68   : > { %807 = vmatpush.bf16.msra.mxu1 %v1102_v14 }
  0x69   : > { %820 = vmatpush.bf16.msra.mxu2 %v1110_v15 }
  0x6a   : > { %833 = vmatpush.bf16.msra.mxu3 %v1118_v16 }
  0x6b   : > { %795 = vmatpush.bf16.msra.mxu0 %v1093_v17 }
  0x6c   : > { %808 = vmatpush.bf16.msra.mxu1 %v1101_v18 }
  0x6d   : > { %821 = vmatpush.bf16.msra.mxu2 %v1109_v19 }
  0x6e   : > { %834 = vmatpush.bf16.msra.mxu3 %v1117_v20 }
  0x6f   : > { %796 = vmatpush.bf16.msra.mxu0 %v1092_v21 }
  0x70   : > { %809 = vmatpush.bf16.msra.mxu1 %v1100_v22 }
  0x71   : > { %822 = vmatpush.bf16.msra.mxu2 %v1108_v23 }
  0x72   : > { %835 = vmatpush.bf16.msra.mxu3 %v1116_v24 }
  0x73   : > { %797 = vmatpush.bf16.msra.mxu0 %v1091_v25 }
  0x74   : > { %810 = vmatpush.bf16.msra.mxu1 %v1099_v26 }
  0x75   : > { %823 = vmatpush.bf16.msra.mxu2 %v1107_v27 }
  0x76   : > { %836 = vmatpush.bf16.msra.mxu3 %v1115_v28 }
  0x77   : > { %798 = vmatpush.bf16.msra.mxu0 %v1090_v29 }
  0x78   : > { %811 = vmatpush.bf16.msra.mxu1 %v1098_v30 }
  0x79   : > { %824 = vmatpush.bf16.msra.mxu2 %v1106_v31 }
  0x7a   : > { %837 = vmatpush.bf16.msra.mxu3 %v1114_v32  ;;  %799 = vmatmul.bf16.vlgmr.msra.gmra.mxu0 %v591_v33 }
  0x7b   : > { %812 = vmatmul.bf16.vlgmr.msra.gmra.mxu1 %v592_v34 }
  0x7c   : > { %825 = vmatmul.bf16.vlgmr.msra.gmra.mxu2 %v593_v35 }
  0x7d   : > { %838 = vmatmul.bf16.vlgmr.msra.gmra.mxu3 %v594_v36 }
  0xf7   : > { %v800_v38 = vpop.f32.mrf.mxu0 }
  0xf8   : > { %v813_v39 = vpop.f32.mrf.mxu1 }
  0xf9   : > { %v814_v40 = vadd.f32 %v813_v39, %v800_v38 }
  0xff   : > { %v826_v41 = vpop.f32.mrf.mxu2  ;;  %v802_v44 = vpop.f32.mrf.mxu0 }
 0x100   : > { %v839_v42 = vpop.f32.mrf.mxu3  ;;  %v827_v43 = vadd.f32 %v826_v41, %v814_v40  ;;  %v815_v45 = vpop.f32.mrf.mxu1 }
 0x102   : > { %v840_v47 = vadd.f32 %v839_v42, %v827_v43 }
 0x104   : > { %v843_v48 = vadd.f32 %v840_v47, %v523_v46 }
 0x106   : > { %844 = vst [vmem:[#allocation2] sm:$0xf] %v843_v48 }
 0x107   : > { %v828_v49 = vpop.f32.mrf.mxu2 }
 0x108   : > { %v841_v50 = vpop.f32.mrf.mxu3 }
 0x10d   : > { %v848_v52 = vld [vmem:[#allocation2] sm:$0xf] }
 0x10e   : > { %v853_v53 = vadd.f32 %v1163_v51, %v848_v52 }
 0x110   : > { %v854_v54 = vmax.f32 %v853_v53, 0.0 }
 0x112   : > { %855 = vst [vmem:[%s517_s12] sm:$0xf] %v854_v54 }
 0x113 PF: > { %s13_s16 = sadd.s32 1, %s1202_s16   ;;  %s1467_s12 = smov %s1190_s13 }
 0x114   : > { %p10_p10 = scmp.ge.s32.totalorder %s13_s16, 4   ;;  %s1468_s13 = smov %s1260_s20 }
 0x115   : > { %s1469_s14 = smov %s1198_s15  ;;  %s1470_s15 = smov %s1472_s17 }
 0x116   :  { %12 = sbr.rel (!%p10_p10) target bundleno = 3 (0x3), region = 122 }

// kernel: encoder_mlp_forward.9
= control target key start
LH: loop header
LB: loop body
LE: loop exit
PB: predicated region body
PF: predicated region fallthrough
CT: control target
= control target key end

     0   :  { %vm116_vm3 = vcmask 11264   ;;  %s252_s1 = inlined_call_operand.vmem [shape: f32[256,2], index: 1, kind: input, shape index: {}]   ;;  %s253_s0 = inlined_call_operand.vmem [shape: f32[4,256], index: 0, kind: input, shape index: {}]   ;;  %s254_s2 = inlined_call_operand.vmem [shape: f32[1,2], index: 2, kind: input, shape index: {}]   ;;  %s255_s3 = inlined_call_operand.vmem [shape: f32[4,2], index: 3, kind: output, shape index: {}]  }
   0x1   :  { %v30_v0 = vld [vmem:[%s252_s1 + $0x78] sm:$0xff]  ;;  %v29_v1 = vld [vmem:[%s252_s1 + $0x70] sm:$0xff]  ;;  %v28_v4 = vld [vmem:[%s252_s1 + $0x68] sm:$0xff] }
   0x2   :  { %v46_v2 = vld [vmem:[%s252_s1 + $0xf8] sm:$0xff]  ;;  %57 = vmatpush.msra.mxu0 %v30_v0  ;;  %v45_v3 = vld [vmem:[%s252_s1 + $0xf0] sm:$0xff]  ;;  %v44_v5 = vld [vmem:[%s252_s1 + $0xe8] sm:$0xff] }
   0x3   :  { %77 = vmatpush.msra.mxu1 %v46_v2  ;;  %v27_v6 = vld [vmem:[%s252_s1 + $0x60] sm:$0xff]  ;;  %v26_v8 = vld [vmem:[%s252_s1 + $0x58] sm:$0xff]  ;;  %v25_v10 = vld [vmem:[%s252_s1 + $0x50] sm:$0xff] }
   0x4   :  { %58 = vmatpush.msra.mxu0 %v29_v1  ;;  %v43_v7 = vld [vmem:[%s252_s1 + $0xe0] sm:$0xff]  ;;  %v42_v9 = vld [vmem:[%s252_s1 + $0xd8] sm:$0xff]  ;;  %v41_v11 = vld [vmem:[%s252_s1 + $0xd0] sm:$0xff] }
   0x5   :  { %78 = vmatpush.msra.mxu1 %v45_v3  ;;  %v24_v12 = vld [vmem:[%s252_s1 + $0x48] sm:$0xff]  ;;  %v14_v14 = vld [vmem:[%s253_s0] sm:$0xff]  ;;  %v22_v17 = vld [vmem:[%s252_s1 + $0x38] sm:$0xff] }
   0x6   :  { %59 = vmatpush.msra.mxu0 %v28_v4  ;;  %v40_v13 = vld [vmem:[%s252_s1 + $0xc8] sm:$0xff]  ;;  %52 = vst [vmem:[#allocation1] ss:$2 sm:$0xff] %v14_v14  ;;  %v23_v15 = vld [vmem:[%s252_s1 + $0x40] sm:$0xff]  ;;  %v38_v18 = vld [vmem:[%s252_s1 + $0xb8] sm:$0xff] }
   0x7   :  { %79 = vmatpush.msra.mxu1 %v44_v5  ;;  %v39_v16 = vld [vmem:[%s252_s1 + $0xc0] sm:$0xff]  ;;  %v21_v19 = vld [vmem:[%s252_s1 + $0x30] sm:$0xff]  ;;  %v20_v21 = vld [vmem:[%s252_s1 + $0x28] sm:$0xff] }
   0x8   :  { %60 = vmatpush.msra.mxu0 %v27_v6  ;;  %v37_v20 = vld [vmem:[%s252_s1 + $0xb0] sm:$0xff]  ;;  %v36_v22 = vld [vmem:[%s252_s1 + $0xa8] sm:$0xff]  ;;  %v19_v23 = vld [vmem:[%s252_s1 + $0x20] sm:$0xff] }
   0x9   :  { %80 = vmatpush.msra.mxu1 %v43_v7  ;;  %v35_v24 = vld [vmem:[%s252_s1 + $0xa0] sm:$0xff]  ;;  %v18_v25 = vld [vmem:[%s252_s1 + $0x18] sm:$0xff]  ;;  %v17_v27 = vld [vmem:[%s252_s1 + $0x10] sm:$0xff] }
   0xa   :  { %61 = vmatpush.msra.mxu0 %v26_v8  ;;  %v34_v26 = vld [vmem:[%s252_s1 + $0x98] sm:$0xff]  ;;  %v33_v28 = vld [vmem:[%s252_s1 + $0x90] sm:$0xff]  ;;  %v16_v29 = vld [vmem:[%s252_s1 + $0x8] sm:$0xff] }
   0xb   :  { %81 = vmatpush.msra.mxu1 %v42_v9  ;;  %v32_v30 = vld [vmem:[%s252_s1 + $0x88] sm:$0xff]  ;;  %v15_v31 = vld [vmem:[%s252_s1] sm:$0xff] }
   0xc   :  { %62 = vmatpush.msra.mxu0 %v25_v10  ;;  %v31_v32 = vld [vmem:[%s252_s1 + $0x80] sm:$0xff] }
   0xd   :  { %82 = vmatpush.msra.mxu1 %v41_v11  ;;  %v53_v33 = vld.sshfl [vmem:[#allocation1] sm:$0xff pattern:$0x75316420]  ;;  %v54_v34 = vld.sshfl [vmem:[#allocation1 + $0x8] sm:$0xff pattern:$0x75316420] }
   0xe   :  { %63 = vmatpush.msra.mxu0 %v24_v12  ;;  %v122_v35 = vld [vmem:[%s254_s2] ss:$0 sm:$0xff] }
   0xf   :  { %83 = vmatpush.msra.mxu1 %v40_v13 }
  0x10   :  { %64 = vmatpush.msra.mxu0 %v23_v15 }
  0x11   :  { %84 = vmatpush.msra.mxu1 %v39_v16 }
  0x12   :  { %65 = vmatpush.msra.mxu0 %v22_v17 }
  0x13   :  { %85 = vmatpush.msra.mxu1 %v38_v18 }
  0x14   :  { %66 = vmatpush.msra.mxu0 %v21_v19 }
  0x15   :  { %86 = vmatpush.msra.mxu1 %v37_v20 }
  0x16   :  { %67 = vmatpush.msra.mxu0 %v20_v21 }
  0x17   :  { %87 = vmatpush.msra.mxu1 %v36_v22 }
  0x18   :  { %68 = vmatpush.msra.mxu0 %v19_v23 }
  0x19   :  { %88 = vmatpush.msra.mxu1 %v35_v24 }
  0x1a   :  { %69 = vmatpush.msra.mxu0 %v18_v25 }
  0x1b   :  { %89 = vmatpush.msra.mxu1 %v34_v26 }
  0x1c   :  { %70 = vmatpush.msra.mxu0 %v17_v27 }
  0x1d   :  { %90 = vmatpush.msra.mxu1 %v33_v28 }
  0x1e   :  { %71 = vmatpush.msra.mxu0 %v16_v29 }
  0x1f   :  { %91 = vmatpush.msra.mxu1 %v32_v30 }
  0x20   :  { %72 = vmatpush.msra.mxu0 %v15_v31 }
  0x21   :  { %92 = vmatpush.msra.mxu1 %v31_v32  ;;  %73 = vmatmul.f32.vlgmr.msra.gmra.mxu0 %v53_v33 }
  0x22   :  { %93 = vmatmul.f32.vlgmr.msra.gmra.mxu1 %v54_v34 }
  0x9e   :  { %v74_v36 = vpop.f32.mrf.mxu0 }
  0x9f   :  { %v94_v37 = vpop.f32.mrf.mxu1  ;;  %v75_v38 = vadd.f32 %v122_v35, %v74_v36 }
  0xa1   :  { %v95_v39 = vadd.f32 %v94_v37, %v75_v38 }
  0xa3   :  { %v97_v40 = vsub.f32 0.0, %v95_v39 }
  0xa5   :  { %v98_v41 = vmul.f32 1.442695, %v97_v40 }
  0xa7   :  { %123 = vpow2.f32 %v98_v41 }
  0xad   :  { %v124_v42 = vpop.eup %123 }
  0xae   :  { %v100_v43 = vadd.f32 1.0, %v124_v42 }
  0xb0   :  { %125 = vrcp.f32 %v100_v43  ;;  %v112_v47 = vand.u32 2147483648, %v100_v43  ;;  %v110_v49 = vand.u32 2147483647, %v100_v43  ;;  %vm106_vm1 = vweird.f32 %v100_v43 }
  0xb2   :  { %v113_v51 = vor.u32 1.1754944e-38, %v112_v47  ;;  %vm111_vm4 = vcmp.eq.f32.partialorder %v110_v49, 8.507059e+37 }
  0xb6   :  { %v126_v44 = vpop.eup %125 }
  0xb7   :  { %v102_v45 = vmul.f32 %v126_v44, %v100_v43  ;;  %vm107_vm0 = vweird.f32 %v126_v44 }
  0xb8   :  { %vm108_vm2 = vmor %vm106_vm1, %vm107_vm0 }
  0xb9   :  { %v103_v46 = vsub.f32 1.0, %v102_v45 }
  0xbb   :  { %v104_v48 = vmul.f32 %v126_v44, %v103_v46 }
  0xbd   :  { %v105_v50 = vadd.f32 %v126_v44, %v104_v48 }
  0xbf   :  { %v109_v52 = vsel %vm108_vm2, %v126_v44, %v105_v50 }
  0xc0   :  { %v114_v53 = vsel %vm111_vm4, %v113_v51, %v109_v52 }
  0xc1   :  { %117 = vst.msk [vmem:[%s255_s3] sm:$0xf] %vm116_vm3, %v114_v53 }

</bundles_post_ra>
